<compile_context>
chip_gen: v7x
topology: tpu7x:2x2x1
jax: 0.10.0
libtpu: 0.0.40
codegen_flags: <defaults>
</compile_context>

<pallas_src>
import functools

import jax
import jax.numpy as jnp
import numpy as np
from jax.experimental import pallas as pl
from jax.experimental.pallas import tpu as pltpu


def _scconv_kernel(x_ref, gagg_ref, colpack_ref, mask_ref, w_up_ref, w_gwc_ref,
                   w_y2_ref, o_ref, win_ref, *, up_c, up_sq_pad, W, K,
                   hw_true, group_elems, eps, gate):
    f32 = jnp.float32
    bt, C, HWp = x_ref.shape
    G = gagg_ref.shape[0]
    mxu = w_up_ref.dtype                      # MXU operand dtype (bf16 by default)
    half = K // 2
    inv_n = 1.0 / group_elems
    inv_hw = 1.0 / hw_true

    # -------- batch-invariant constants, hoisted out of the batch loop -------
    gagg = gagg_ref[...]                      # (G, C)  group segment-sum matrix
    colp = colpack_ref[...]                   # (C, 4+G)
    gamma = colp[:, 0:1]
    beta = colp[:, 1:2]
    wg = colp[:, 2:3]                         # gamma / sum(gamma)
    b_col = colp[:, 3:4]                      # GWC bias
    gbk = colp[:, 4:4 + G]                    # (C, G) broadcast-back matrix
    masks = mask_ref[...]                     # (K*K, HWp) 0/1 boundary masks
    mask_rows = [masks[t:t + 1, :] for t in range(K * K)]
    w_up = w_up_ref[...]                      # (up_sq_pad + C, up_c)  bf16
    w_gwc = w_gwc_ref[...]                    # (C, K*K*up_sq_pad)     bf16
    w_y2 = w_y2_ref[...]                      # (C, low_c)             bf16

    for b in range(bt):                       # static unroll over the batch tile
        x = x_ref[b].astype(f32)              # (C, HWp), f32 compute

        # ---------------- SRU: GroupNorm gate + channel reconstruct ----------
        chsum = jnp.sum(x, axis=1, keepdims=True)            # (C, 1)
        chsq = jnp.sum(x * x, axis=1, keepdims=True)          # (C, 1)
        gstats = jnp.dot(gagg, jnp.concatenate([chsum, chsq], axis=1),
                         preferred_element_type=f32)          # (G, 2)
        gmean = gstats[:, 0:1] * inv_n
        gvar = gstats[:, 1:2] * inv_n - gmean * gmean          # biased variance
        ginv = jax.lax.rsqrt(gvar + eps)
        per_ch = jnp.dot(gbk, jnp.concatenate([gmean, ginv], axis=1),
                         preferred_element_type=f32)          # (C, 2)
        scale = per_ch[:, 1:2] * gamma                        # inv_std * gamma
        shift = beta - per_ch[:, 0:1] * scale
        # only the gate needs GN -> fold w_gamma into the per-channel affine
        z = x * (scale * wg) + shift * wg
        rw = 0.5 * jnp.tanh(0.5 * z) + 0.5                    # sigmoid (EUP)
        hot = rw > gate
        rx = rw * x
        w1x = jnp.where(hot, x, rx)                           # w1 * x
        w2x = jnp.where(hot, 0.0, rx)                         # w2 * x
        h = C // 2
        if up_c == h:                          # alpha = 0.5: no concatenate
            up = w1x[:h] + w2x[h:]
            low = w1x[h:] + w2x[:h]
        else:                                  # general alpha path
            y = jnp.concatenate([w1x[:h] + w2x[h:], w1x[h:] + w2x[:h]], axis=0)
            up = y[:up_c]
            low = y[up_c:]

        # ---------------- CRU ------------------------------------------------
        # squeeze1 and (PWC1 @ squeeze1) share RHS `up`: one stacked matmul.
        t = jnp.dot(w_up, up.astype(mxu), preferred_element_type=f32)
        up_s = t[:up_sq_pad]                                  # squeeze1(up)
        pwc1 = t[up_sq_pad:]                                  # PWC1(squeeze1(up))

        # Grouped KxK conv = ONE wide matmul over shifted/masked windows,
        # streamed tap-by-tap into the bf16 VMEM scratch.
        for ky in range(K):
            for kx in range(K):
                tap = ky * K + kx
                off = (ky - half) * W + (kx - half)
                shifted = (pltpu.roll(up_s, (-off) % HWp, axis=1)
                           if off else up_s)
                win = shifted * mask_rows[tap]                 # zero-pad boundary
                win_ref[pl.ds(tap * up_sq_pad, up_sq_pad), :] = win.astype(mxu)

        y1 = (jnp.dot(w_gwc, win_ref[...], preferred_element_type=f32)
              + b_col + pwc1)
        y2 = jnp.dot(w_y2, low.astype(mxu), preferred_element_type=f32)

        # out = softmax(avg_pool(cat[Y1,Y2])) * cat[Y1,Y2]; out1+out2 folded.
        a1 = jnp.sum(y1, axis=1, keepdims=True) * inv_hw       # (C, 1)
        a2 = jnp.sum(y2, axis=1, keepdims=True) * inv_hw
        if HWp != hw_true:
            # padded lanes contribute exactly b_col to Y1's row sums
            a1 = a1 - (float(HWp - hw_true) * inv_hw) * b_col
        m = jnp.maximum(jnp.max(a1, keepdims=True), jnp.max(a2, keepdims=True))
        e1 = jnp.exp(a1 - m)
        e2 = jnp.exp(a2 - m)
        denom = jnp.sum(e1, keepdims=True) + jnp.sum(e2, keepdims=True)
        inv_d = pl.reciprocal(denom, approx=False)   # (1,1) exact divide: free
        o_ref[b] = ((e1 * inv_d) * y1 + (e2 * inv_d) * y2).astype(o_ref.dtype)


def init_scconv_params(key, op_channel, *, alpha=0.5, squeeze_radio=2,
                       group_size=2, group_kernel_size=3):
    C = op_channel
    up_c = int(alpha * C)
    low_c = C - up_c
    up_sq = up_c // squeeze_radio
    low_sq = low_c // squeeze_radio
    K = group_kernel_size
    ks = jax.random.split(key, 8)
    gamma = 0.5 + jax.random.uniform(ks[0], (C,), jnp.float32)        # GN weight
    beta = 0.05 * jax.random.normal(ks[1], (C,), jnp.float32)         # GN bias
    w_sq1 = jax.random.normal(ks[2], (up_sq, up_c, 1, 1), jnp.float32) * 0.3
    w_sq2 = jax.random.normal(ks[3], (low_sq, low_c, 1, 1), jnp.float32) * 0.3
    w_gwc = jax.random.normal(ks[4], (C, up_sq // group_size, K, K), jnp.float32) * 0.2
    b_gwc = jax.random.normal(ks[5], (C,), jnp.float32) * 0.1
    w_pwc1 = jax.random.normal(ks[6], (C, up_sq, 1, 1), jnp.float32) * 0.3
    w_pwc2 = jax.random.normal(ks[7], (C - low_sq, low_sq, 1, 1), jnp.float32) * 0.3
    return (gamma, beta, w_sq1, w_sq2, w_gwc, b_gwc, w_pwc1, w_pwc2)


def scconv_forward_pallas(x, params, *, group_num=4, gate_treshold=0.5,
                          alpha=0.5, squeeze_radio=2, group_size=2,
                          group_kernel_size=3, eps=1e-5,
                          io_dtype=jnp.float32, mxu_dtype=jnp.bfloat16,
                          batch_block=None):
    B, C, H, W = x.shape
    HW = H * W
    HWp = -(-HW // 128) * 128               # lane-align the spatial axis
    up_c = int(alpha * C)
    low_c = C - up_c
    up_sq = up_c // squeeze_radio
    low_sq = low_c // squeeze_radio
    K = group_kernel_size
    G = group_num
    f32 = jnp.float32

    gamma, beta, w_sq1, w_sq2, w_gwc, b_gwc, w_pwc1, w_pwc2 = params

    # ---------------- parameter glue (trace-time, plain JAX / numpy) ---------
    cpg = C // G
    gids = np.repeat(np.arange(G), cpg)
    gagg = jnp.asarray((np.arange(G)[:, None] == gids[None, :]).astype(np.float32))  # (G, C)
    gbk_np = (gids[:, None] == np.arange(G)[None, :]).astype(np.float32)             # (C, G)

    colpack = jnp.concatenate([
        gamma.reshape(C, 1), beta.reshape(C, 1),
        (gamma / jnp.sum(gamma)).reshape(C, 1),
        b_gwc.reshape(C, 1), jnp.asarray(gbk_np)], axis=1).astype(f32)    # (C, 4+G)

    w_sq1_2d = w_sq1.reshape(up_sq, up_c).astype(f32)
    w_sq2_2d = w_sq2.reshape(low_sq, low_c).astype(f32)
    w_pwc1_2d = w_pwc1.reshape(C, up_sq).astype(f32)

    # squeeze1 rows padded so each tap's window block is sublane-aligned in the
    # (possibly bf16-packed) scratch layout.
    row_align = 16 if jnp.dtype(mxu_dtype).itemsize == 2 else 8
    up_sq_pad = -(-up_sq // row_align) * row_align
    w_sq1_pad = jnp.zeros((up_sq_pad, up_c), f32).at[:up_sq].set(w_sq1_2d)
    # fold: PWC1(squeeze1(up)) == (W_pwc1 @ W_sq1) @ up -> shares RHS with squeeze1
    w_up = jnp.concatenate([w_sq1_pad, w_pwc1_2d @ w_sq1_2d], axis=0)     # (up_sq_pad + C, up_c)
    # fold: cat([PWC2(low_s), low_s]) == ([W_pwc2 ; I] @ W_sq2) @ low
    w2aug = jnp.concatenate([w_pwc2.reshape(C - low_sq, low_sq).astype(f32),
                             jnp.eye(low_sq, dtype=f32)], axis=0)         # (C, low_sq)
    w_y2 = w2aug @ w_sq2_2d                                               # (C, low_c)

    # grouped KxK weight -> per-tap block-diagonal -> ONE wide (C, K*K*up_sq_pad)
    cin_g = up_sq // group_size
    cout_g = C // group_size
    w_bd = jnp.zeros((K * K, C, up_sq_pad), f32)
    for g in range(group_size):
        blk = jnp.transpose(w_gwc[g * cout_g:(g + 1) * cout_g].astype(f32),
                            (2, 3, 0, 1)).reshape(K * K, cout_g, cin_g)
        w_bd = w_bd.at[:, g * cout_g:(g + 1) * cout_g,
                       g * cin_g:(g + 1) * cin_g].set(blk)
    w_gwc_wide = jnp.transpose(w_bd, (1, 0, 2)).reshape(C, K * K * up_sq_pad)

    # boundary-validity masks precomputed once on the host
    posn = np.arange(HWp)
    rown = posn // W
    coln = posn % W
    half = K // 2
    masks_np = np.zeros((K * K, HWp), np.float32)
    for ky in range(K):
        for kx in range(K):
            dy, dx = ky - half, kx - half
            ok = ((rown + dy >= 0) & (rown + dy < H) &
                  (coln + dx >= 0) & (coln + dx < W) & (posn < HW))
            masks_np[ky * K + kx] = ok
    masks = jnp.asarray(masks_np)

    # MXU operands shipped in bf16 (elementwise math stays f32 in-kernel)
    w_up = w_up.astype(mxu_dtype)
    w_gwc_wide = w_gwc_wide.astype(mxu_dtype)
    w_y2 = w_y2.astype(mxu_dtype)

    # activations: NCHW -> (B, C, HWp) (zero-padded spatial tail)
    x_flat = x.reshape(B, C, HW)
    if HWp != HW:
        x_flat = jnp.pad(x_flat, ((0, 0), (0, 0), (0, HWp - HW)))
    x_flat = x_flat.astype(io_dtype)

    # batch tile: amortize per-step overhead; keep >=2 grid steps when B>=4 so
    # both v7x TensorCores stay busy.
    if batch_block is None:
        cap = B // 2 if B >= 4 else B
        cap = max(1, min(cap, 8))
        bt = 1
        for cand in range(cap, 0, -1):
            if B % cand == 0 and cand * C * HWp * 4 <= (2 << 20):
                bt = cand
                break
    else:
        bt = batch_block
    assert B % bt == 0, "batch_block must divide the batch size"

    # explicit VMEM budget (default scoped limit is only 32 MiB; v7x has 64 MiB)
    io_sz = jnp.dtype(io_dtype).itemsize
    mx_sz = jnp.dtype(mxu_dtype).itemsize
    est = (2 * 2 * bt * C * HWp * io_sz                              # in + out, dbl-buffered
           + 2 * (gagg.size + colpack.size + masks.size) * 4
           + 2 * (w_up.size + w_gwc_wide.size + w_y2.size) * mx_sz
           + K * K * up_sq_pad * HWp * mx_sz                         # window scratch
           + (12 * C + up_sq_pad + C) * HWp * 4)                     # live f32 temporaries
    vmem_limit = int(min(64 * 2 ** 20, max(32 * 2 ** 20, 2 * int(est))))

    kernel = functools.partial(
        _scconv_kernel, up_c=up_c, up_sq_pad=up_sq_pad, W=W, K=K,
        hw_true=HW, group_elems=float(cpg * HW), eps=float(eps),
        gate=float(gate_treshold))

    out = pl.pallas_call(
        kernel,
        out_shape=jax.ShapeDtypeStruct((B, C, HWp), io_dtype),
        grid_spec=pltpu.PrefetchScalarGridSpec(
            num_scalar_prefetch=0,
            grid=(B // bt,),
            in_specs=[
                pl.BlockSpec((bt, C, HWp), lambda b: (b, 0, 0)),
                pl.BlockSpec((G, C), lambda b: (0, 0)),
                pl.BlockSpec((C, 4 + G), lambda b: (0, 0)),
                pl.BlockSpec((K * K, HWp), lambda b: (0, 0)),
                pl.BlockSpec((up_sq_pad + C, up_c), lambda b: (0, 0)),
                pl.BlockSpec((C, K * K * up_sq_pad), lambda b: (0, 0)),
                pl.BlockSpec((C, low_c), lambda b: (0, 0)),
            ],
            out_specs=pl.BlockSpec((bt, C, HWp), lambda b: (b, 0, 0)),
            scratch_shapes=[pltpu.VMEM((K * K * up_sq_pad, HWp), mxu_dtype)],
        ),
        compiler_params=pltpu.CompilerParams(
            dimension_semantics=("parallel",),        # megacore split on v7x
            vmem_limit_bytes=vmem_limit),
    )(x_flat, gagg, colpack, masks, w_up, w_gwc_wide, w_y2)

    return out[:, :, :HW].reshape(B, C, H, W)


def scconv_forward_reference(x, params, *, group_num=4, gate_treshold=0.5,
                             alpha=0.5, squeeze_radio=2, group_size=2,
                             group_kernel_size=3, eps=1e-5):
    """Pure-JAX reference mirroring the PyTorch ScConv forward (NCHW)."""
    B, C, H, W = x.shape
    gamma, beta, w_sq1, w_sq2, w_gwc, b_gwc, w_pwc1, w_pwc2 = params

    # ---- SRU: nn.GroupNorm + sigmoid gate + reconstruct ----
    xg = x.reshape(B, group_num, -1)
    mean = jnp.mean(xg, axis=2, keepdims=True)
    var = jnp.mean(xg * xg, axis=2, keepdims=True) - mean * mean     # biased
    xn = (xg - mean) * jax.lax.rsqrt(var + eps)
    gn = (xn.reshape(B, C, H, W) * gamma[None, :, None, None]
          + beta[None, :, None, None])
    wg = (gamma / jnp.sum(gamma))[None, :, None, None]
    z = gn * wg
    rw = 0.5 * jnp.tanh(0.5 * z) + 0.5                               # sigmoid
    w1 = jnp.where(rw > gate_treshold, 1.0, rw)
    w2 = jnp.where(rw > gate_treshold, 0.0, rw)
    x1 = w1 * x
    x2 = w2 * x
    h = C // 2
    y = jnp.concatenate([x1[:, :h] + x2[:, h:], x1[:, h:] + x2[:, :h]], axis=1)

    # ---- CRU ----
    up_c = int(alpha * C)

    def conv1x1(z4, w4d):
        return jnp.einsum('oi,bihw->bohw', w4d[:, :, 0, 0], z4,
                          precision='highest')

    up, low = y[:, :up_c], y[:, up_c:]
    up_s = conv1x1(up, w_sq1)
    low_s = conv1x1(low, w_sq2)
    gwc = jax.lax.conv_general_dilated(
        up_s, w_gwc, window_strides=(1, 1), padding='SAME',
        feature_group_count=group_size,
        dimension_numbers=('NCHW', 'OIHW', 'NCHW'),
        precision=jax.lax.Precision.HIGHEST) + b_gwc[None, :, None, None]
    y1 = gwc + conv1x1(up_s, w_pwc1)
    y2 = jnp.concatenate([conv1x1(low_s, w_pwc2), low_s], axis=1)
    out = jnp.concatenate([y1, y2], axis=1)
    avg = jnp.mean(out, axis=(2, 3), keepdims=True)
    out = jax.nn.softmax(avg, axis=1) * out
    return out[:, :C] + out[:, C:]


if __name__ == "__main__":
    key = jax.random.PRNGKey(0)
    kx, kp = jax.random.split(key)

    # --- aligned case: B=2, C=16, 16x16 (HW = 256, lane-aligned), bt=2 ---
    B, C, H, W = 2, 16, 16, 16
    x = jax.random.normal(kx, (B, C, H, W), jnp.float32)
    params = init_scconv_params(kp, C)

    y = jax.block_until_ready(scconv_forward_pallas(x, params))
    y_ref = jax.block_until_ready(scconv_forward_reference(x, params))
    np.testing.assert_allclose(np.asarray(y), np.asarray(y_ref),
                               rtol=2e-2, atol=2e-2)

    # --- bf16 activation I/O, 1 image per grid step (grid=2, megacore path) ---
    y_bf = jax.block_until_ready(
        scconv_forward_pallas(x, params, io_dtype=jnp.bfloat16, batch_block=1))
    x_rounded = x.astype(jnp.bfloat16).astype(jnp.float32)
    y_ref_bf = jax.block_until_ready(scconv_forward_reference(x_rounded, params))
    np.testing.assert_allclose(np.asarray(y_bf.astype(jnp.float32)),
                               np.asarray(y_ref_bf), rtol=3e-2, atol=3e-2)

    # --- lane-unaligned spatial (HW = 63 -> padded to 128) and odd batch ---
    B2, H2, W2 = 3, 7, 9
    x2 = jax.random.normal(jax.random.PRNGKey(1), (B2, C, H2, W2), jnp.float32)
    y2 = jax.block_until_ready(scconv_forward_pallas(x2, params))
    y2_ref = jax.block_until_ready(scconv_forward_reference(x2, params))
    np.testing.assert_allclose(np.asarray(y2), np.asarray(y2_ref),
                               rtol=2e-2, atol=2e-2)

    print("KERNEL_OK")
</pallas_src>

<mosaic_0001>
module attributes {stable_mosaic.version = 11 : i64} {
  func.func @_scconv_kernel(%arg0: i32, %arg1: memref<2x16x256xf32, #tpu.memory_space<vmem>>, %arg2: memref<4x16xf32, #tpu.memory_space<vmem>>, %arg3: memref<16x8xf32, #tpu.memory_space<vmem>>, %arg4: memref<9x256xf32, #tpu.memory_space<vmem>>, %arg5: memref<32x8xbf16, #tpu.memory_space<vmem>>, %arg6: memref<16x144xbf16, #tpu.memory_space<vmem>>, %arg7: memref<16x8xbf16, #tpu.memory_space<vmem>>, %arg8: memref<2x16x256xf32, #tpu.memory_space<vmem>>, %arg9: memref<144x256xbf16, #tpu.memory_space<vmem>>) attributes {dimension_semantics = [#tpu.dimension_semantics<parallel>], iteration_bounds = array<i64: 1>, scalar_prefetch = 0 : i64, scratch_operands = 1 : i64, tpu.core_type = #tpu.core_type<tc>, window_params = [{transform_indices = @transform_0, window_bounds = array<i64: 2, 16, 256>}, {pipeline_mode = #tpu.pipeline_mode<synchronous>, transform_indices = @transform_1, window_bounds = array<i64: 4, 16>}, {pipeline_mode = #tpu.pipeline_mode<synchronous>, transform_indices = @transform_2, window_bounds = array<i64: 16, 8>}, {pipeline_mode = #tpu.pipeline_mode<synchronous>, transform_indices = @transform_3, window_bounds = array<i64: 9, 256>}, {pipeline_mode = #tpu.pipeline_mode<synchronous>, transform_indices = @transform_4, window_bounds = array<i64: 32, 8>}, {pipeline_mode = #tpu.pipeline_mode<synchronous>, transform_indices = @transform_5, window_bounds = array<i64: 16, 144>}, {pipeline_mode = #tpu.pipeline_mode<synchronous>, transform_indices = @transform_6, window_bounds = array<i64: 16, 8>}, {transform_indices = @transform_7, window_bounds = array<i64: 2, 16, 256>}]} {
    %c0 = arith.constant 0 : index
    %c0_0 = arith.constant 0 : index
    %0 = vector.load %arg2[%c0, %c0_0] : memref<4x16xf32, #tpu.memory_space<vmem>>, vector<4x16xf32>
    %c0_1 = arith.constant 0 : index
    %c0_2 = arith.constant 0 : index
    %1 = vector.load %arg3[%c0_1, %c0_2] : memref<16x8xf32, #tpu.memory_space<vmem>>, vector<16x8xf32>
    %2 = vector.extract_strided_slice %1 {offsets = [0, 0], sizes = [16, 1], strides = [1, 1]} : vector<16x8xf32> to vector<16x1xf32>
    %3 = vector.extract_strided_slice %1 {offsets = [0, 1], sizes = [16, 1], strides = [1, 1]} : vector<16x8xf32> to vector<16x1xf32>
    %4 = vector.extract_strided_slice %1 {offsets = [0, 2], sizes = [16, 1], strides = [1, 1]} : vector<16x8xf32> to vector<16x1xf32>
    %5 = vector.extract_strided_slice %1 {offsets = [0, 3], sizes = [16, 1], strides = [1, 1]} : vector<16x8xf32> to vector<16x1xf32>
    %6 = vector.extract_strided_slice %1 {offsets = [0, 4], sizes = [16, 4], strides = [1, 1]} : vector<16x8xf32> to vector<16x4xf32>
    %c0_3 = arith.constant 0 : index
    %c0_4 = arith.constant 0 : index
    %7 = vector.load %arg4[%c0_3, %c0_4] : memref<9x256xf32, #tpu.memory_space<vmem>>, vector<9x256xf32>
    %8 = vector.extract_strided_slice %7 {offsets = [0, 0], sizes = [1, 256], strides = [1, 1]} : vector<9x256xf32> to vector<1x256xf32>
    %9 = vector.extract_strided_slice %7 {offsets = [1, 0], sizes = [1, 256], strides = [1, 1]} : vector<9x256xf32> to vector<1x256xf32>
    %10 = vector.extract_strided_slice %7 {offsets = [2, 0], sizes = [1, 256], strides = [1, 1]} : vector<9x256xf32> to vector<1x256xf32>
    %11 = vector.extract_strided_slice %7 {offsets = [3, 0], sizes = [1, 256], strides = [1, 1]} : vector<9x256xf32> to vector<1x256xf32>
    %12 = vector.extract_strided_slice %7 {offsets = [4, 0], sizes = [1, 256], strides = [1, 1]} : vector<9x256xf32> to vector<1x256xf32>
    %13 = vector.extract_strided_slice %7 {offsets = [5, 0], sizes = [1, 256], strides = [1, 1]} : vector<9x256xf32> to vector<1x256xf32>
    %14 = vector.extract_strided_slice %7 {offsets = [6, 0], sizes = [1, 256], strides = [1, 1]} : vector<9x256xf32> to vector<1x256xf32>
    %15 = vector.extract_strided_slice %7 {offsets = [7, 0], sizes = [1, 256], strides = [1, 1]} : vector<9x256xf32> to vector<1x256xf32>
    %16 = vector.extract_strided_slice %7 {offsets = [8, 0], sizes = [1, 256], strides = [1, 1]} : vector<9x256xf32> to vector<1x256xf32>
    %c0_5 = arith.constant 0 : index
    %c0_6 = arith.constant 0 : index
    %17 = vector.load %arg5[%c0_5, %c0_6] : memref<32x8xbf16, #tpu.memory_space<vmem>>, vector<32x8xbf16>
    %c0_7 = arith.constant 0 : index
    %c0_8 = arith.constant 0 : index
    %18 = vector.load %arg6[%c0_7, %c0_8] : memref<16x144xbf16, #tpu.memory_space<vmem>>, vector<16x144xbf16>
    %c0_9 = arith.constant 0 : index
    %c0_10 = arith.constant 0 : index
    %19 = vector.load %arg7[%c0_9, %c0_10] : memref<16x8xbf16, #tpu.memory_space<vmem>>, vector<16x8xbf16>
    %c0_11 = arith.constant 0 : index
    %c0_12 = arith.constant 0 : index
    %c0_13 = arith.constant 0 : index
    %20 = vector.load %arg1[%c0_11, %c0_12, %c0_13] : memref<2x16x256xf32, #tpu.memory_space<vmem>>, vector<1x16x256xf32>
    %21 = vector.shape_cast %20 : vector<1x16x256xf32> to vector<16x256xf32>
    %cst = arith.constant dense<0.000000e+00> : vector<16xf32>
    %22 = vector.multi_reduction <add>, %21, %cst [1] : vector<16x256xf32> to vector<16xf32>
    %23 = vector.shape_cast %22 : vector<16xf32> to vector<16x1xf32>
    %24 = arith.mulf %21, %21 : vector<16x256xf32>
    %cst_14 = arith.constant dense<0.000000e+00> : vector<16xf32>
    %25 = vector.multi_reduction <add>, %24, %cst_14 [1] : vector<16x256xf32> to vector<16xf32>
    %26 = vector.shape_cast %25 : vector<16xf32> to vector<16x1xf32>
    %27 = tpu.concatenate %23, %26 in 1 : vector<16x1xf32>, vector<16x1xf32> -> vector<16x2xf32>
    %cst_15 = arith.constant dense<0.000000e+00> : vector<4x2xf32>
    %28 = tpu.matmul %0, %27, %cst_15 {dimension_numbers = #tpu.dot_dimension_numbers<[1], [0], [0], [1], [0, 0, 1, 1], [], []>} : vector<4x16xf32>, vector<16x2xf32>, vector<4x2xf32> -> vector<4x2xf32>
    %29 = vector.extract_strided_slice %28 {offsets = [0, 0], sizes = [4, 1], strides = [1, 1]} : vector<4x2xf32> to vector<4x1xf32>
    %cst_16 = arith.constant 9.765625E-4 : f32
    %30 = vector.broadcast %cst_16 : f32 to vector<4x1xf32>
    %31 = arith.mulf %29, %30 : vector<4x1xf32>
    %32 = vector.extract_strided_slice %28 {offsets = [0, 1], sizes = [4, 1], strides = [1, 1]} : vector<4x2xf32> to vector<4x1xf32>
    %cst_17 = arith.constant 9.765625E-4 : f32
    %33 = vector.broadcast %cst_17 : f32 to vector<4x1xf32>
    %34 = arith.mulf %32, %33 : vector<4x1xf32>
    %35 = arith.mulf %31, %31 : vector<4x1xf32>
    %36 = arith.subf %34, %35 : vector<4x1xf32>
    %cst_18 = arith.constant 9.99999974E-6 : f32
    %37 = vector.broadcast %cst_18 : f32 to vector<4x1xf32>
    %38 = arith.addf %36, %37 : vector<4x1xf32>
    %39 = math.rsqrt %38 : vector<4x1xf32>
    %40 = tpu.concatenate %31, %39 in 1 : vector<4x1xf32>, vector<4x1xf32> -> vector<4x2xf32>
    %cst_19 = arith.constant dense<0.000000e+00> : vector<16x2xf32>
    %41 = tpu.matmul %6, %40, %cst_19 {dimension_numbers = #tpu.dot_dimension_numbers<[1], [0], [0], [1], [0, 0, 1, 1], [], []>} : vector<16x4xf32>, vector<4x2xf32>, vector<16x2xf32> -> vector<16x2xf32>
    %42 = vector.extract_strided_slice %41 {offsets = [0, 1], sizes = [16, 1], strides = [1, 1]} : vector<16x2xf32> to vector<16x1xf32>
    %43 = arith.mulf %42, %2 : vector<16x1xf32>
    %44 = vector.extract_strided_slice %41 {offsets = [0, 0], sizes = [16, 1], strides = [1, 1]} : vector<16x2xf32> to vector<16x1xf32>
    %45 = arith.mulf %44, %43 : vector<16x1xf32>
    %46 = arith.subf %3, %45 : vector<16x1xf32>
    %47 = arith.mulf %43, %4 : vector<16x1xf32>
    %48 = vector.broadcast %47 : vector<16x1xf32> to vector<16x256xf32>
    %49 = arith.mulf %21, %48 : vector<16x256xf32>
    %50 = arith.mulf %46, %4 : vector<16x1xf32>
    %51 = vector.broadcast %50 : vector<16x1xf32> to vector<16x256xf32>
    %52 = arith.addf %49, %51 : vector<16x256xf32>
    %cst_20 = arith.constant 5.000000e-01 : f32
    %53 = vector.broadcast %cst_20 : f32 to vector<16x256xf32>
    %54 = arith.mulf %53, %52 : vector<16x256xf32>
    %55 = math.tanh %54 : vector<16x256xf32>
    %cst_21 = arith.constant 5.000000e-01 : f32
    %56 = vector.broadcast %cst_21 : f32 to vector<16x256xf32>
    %57 = arith.mulf %56, %55 : vector<16x256xf32>
    %cst_22 = arith.constant 5.000000e-01 : f32
    %58 = vector.broadcast %cst_22 : f32 to vector<16x256xf32>
    %59 = arith.addf %57, %58 : vector<16x256xf32>
    %cst_23 = arith.constant 5.000000e-01 : f32
    %60 = vector.broadcast %cst_23 : f32 to vector<16x256xf32>
    %61 = arith.cmpf ogt, %59, %60 : vector<16x256xf32>
    %62 = arith.mulf %59, %21 : vector<16x256xf32>
    %63 = arith.select %61, %21, %62 : vector<16x256xi1>, vector<16x256xf32>
    %cst_24 = arith.constant 0.000000e+00 : f32
    %64 = vector.broadcast %cst_24 : f32 to vector<16x256xf32>
    %65 = arith.select %61, %64, %62 : vector<16x256xi1>, vector<16x256xf32>
    %66 = vector.extract_strided_slice %63 {offsets = [0, 0], sizes = [8, 256], strides = [1, 1]} : vector<16x256xf32> to vector<8x256xf32>
    %67 = vector.extract_strided_slice %65 {offsets = [8, 0], sizes = [8, 256], strides = [1, 1]} : vector<16x256xf32> to vector<8x256xf32>
    %68 = arith.addf %66, %67 : vector<8x256xf32>
    %69 = vector.extract_strided_slice %63 {offsets = [8, 0], sizes = [8, 256], strides = [1, 1]} : vector<16x256xf32> to vector<8x256xf32>
    %70 = vector.extract_strided_slice %65 {offsets = [0, 0], sizes = [8, 256], strides = [1, 1]} : vector<16x256xf32> to vector<8x256xf32>
    %71 = arith.addf %69, %70 : vector<8x256xf32>
    %72 = arith.truncf %68 : vector<8x256xf32> to vector<8x256xbf16>
    %cst_25 = arith.constant dense<0.000000e+00> : vector<32x256xf32>
    %73 = tpu.matmul %17, %72, %cst_25 {dimension_numbers = #tpu.dot_dimension_numbers<[1], [0], [0], [1], [0, 0, 1, 1], [], []>} : vector<32x8xbf16>, vector<8x256xbf16>, vector<32x256xf32> -> vector<32x256xf32>
    %74 = vector.extract_strided_slice %73 {offsets = [0, 0], sizes = [16, 256], strides = [1, 1]} : vector<32x256xf32> to vector<16x256xf32>
    %75 = vector.extract_strided_slice %73 {offsets = [16, 0], sizes = [16, 256], strides = [1, 1]} : vector<32x256xf32> to vector<16x256xf32>
    %c17_i32 = arith.constant 17 : i32
    %76 = tpu.dynamic_rotate %74 by %c17_i32 dim 1 : vector<16x256xf32>, i32 -> vector<16x256xf32>
    %77 = vector.broadcast %8 : vector<1x256xf32> to vector<16x256xf32>
    %78 = arith.mulf %76, %77 : vector<16x256xf32>
    %79 = arith.truncf %78 : vector<16x256xf32> to vector<16x256xbf16>
    %c0_26 = arith.constant 0 : index
    %c0_27 = arith.constant 0 : index
    %80 = vector.load %arg9[%c0_26, %c0_27] : memref<144x256xbf16, #tpu.memory_space<vmem>>, vector<16x256xbf16>
    tpu.vector_store %arg9[%c0_26, %c0_27], %79 {strides = array<i32>} : memref<144x256xbf16, #tpu.memory_space<vmem>>, vector<16x256xbf16>,
    %c16_i32 = arith.constant 16 : i32
    %81 = tpu.dynamic_rotate %74 by %c16_i32 dim 1 : vector<16x256xf32>, i32 -> vector<16x256xf32>
    %82 = vector.broadcast %9 : vector<1x256xf32> to vector<16x256xf32>
    %83 = arith.mulf %81, %82 : vector<16x256xf32>
    %84 = arith.truncf %83 : vector<16x256xf32> to vector<16x256xbf16>
    %c16 = arith.constant 16 : index
    %c0_28 = arith.constant 0 : index
    %85 = vector.load %arg9[%c16, %c0_28] : memref<144x256xbf16, #tpu.memory_space<vmem>>, vector<16x256xbf16>
    tpu.vector_store %arg9[%c16, %c0_28], %84 {strides = array<i32>} : memref<144x256xbf16, #tpu.memory_space<vmem>>, vector<16x256xbf16>,
    %c15_i32 = arith.constant 15 : i32
    %86 = tpu.dynamic_rotate %74 by %c15_i32 dim 1 : vector<16x256xf32>, i32 -> vector<16x256xf32>
    %87 = vector.broadcast %10 : vector<1x256xf32> to vector<16x256xf32>
    %88 = arith.mulf %86, %87 : vector<16x256xf32>
    %89 = arith.truncf %88 : vector<16x256xf32> to vector<16x256xbf16>
    %c32 = arith.constant 32 : index
    %c0_29 = arith.constant 0 : index
    %90 = vector.load %arg9[%c32, %c0_29] : memref<144x256xbf16, #tpu.memory_space<vmem>>, vector<16x256xbf16>
    tpu.vector_store %arg9[%c32, %c0_29], %89 {strides = array<i32>} : memref<144x256xbf16, #tpu.memory_space<vmem>>, vector<16x256xbf16>,
    %c1_i32 = arith.constant 1 : i32
    %91 = tpu.dynamic_rotate %74 by %c1_i32 dim 1 : vector<16x256xf32>, i32 -> vector<16x256xf32>
    %92 = vector.broadcast %11 : vector<1x256xf32> to vector<16x256xf32>
    %93 = arith.mulf %91, %92 : vector<16x256xf32>
    %94 = arith.truncf %93 : vector<16x256xf32> to vector<16x256xbf16>
    %c48 = arith.constant 48 : index
    %c0_30 = arith.constant 0 : index
    %95 = vector.load %arg9[%c48, %c0_30] : memref<144x256xbf16, #tpu.memory_space<vmem>>, vector<16x256xbf16>
    tpu.vector_store %arg9[%c48, %c0_30], %94 {strides = array<i32>} : memref<144x256xbf16, #tpu.memory_space<vmem>>, vector<16x256xbf16>,
    %96 = vector.broadcast %12 : vector<1x256xf32> to vector<16x256xf32>
    %97 = arith.mulf %74, %96 : vector<16x256xf32>
    %98 = arith.truncf %97 : vector<16x256xf32> to vector<16x256xbf16>
    %c64 = arith.constant 64 : index
    %c0_31 = arith.constant 0 : index
    %99 = vector.load %arg9[%c64, %c0_31] : memref<144x256xbf16, #tpu.memory_space<vmem>>, vector<16x256xbf16>
    tpu.vector_store %arg9[%c64, %c0_31], %98 {strides = array<i32>} : memref<144x256xbf16, #tpu.memory_space<vmem>>, vector<16x256xbf16>,
    %c255_i32 = arith.constant 255 : i32
    %100 = tpu.dynamic_rotate %74 by %c255_i32 dim 1 : vector<16x256xf32>, i32 -> vector<16x256xf32>
    %101 = vector.broadcast %13 : vector<1x256xf32> to vector<16x256xf32>
    %102 = arith.mulf %100, %101 : vector<16x256xf32>
    %103 = arith.truncf %102 : vector<16x256xf32> to vector<16x256xbf16>
    %c80 = arith.constant 80 : index
    %c0_32 = arith.constant 0 : index
    %104 = vector.load %arg9[%c80, %c0_32] : memref<144x256xbf16, #tpu.memory_space<vmem>>, vector<16x256xbf16>
    tpu.vector_store %arg9[%c80, %c0_32], %103 {strides = array<i32>} : memref<144x256xbf16, #tpu.memory_space<vmem>>, vector<16x256xbf16>,
    %c241_i32 = arith.constant 241 : i32
    %105 = tpu.dynamic_rotate %74 by %c241_i32 dim 1 : vector<16x256xf32>, i32 -> vector<16x256xf32>
    %106 = vector.broadcast %14 : vector<1x256xf32> to vector<16x256xf32>
    %107 = arith.mulf %105, %106 : vector<16x256xf32>
    %108 = arith.truncf %107 : vector<16x256xf32> to vector<16x256xbf16>
    %c96 = arith.constant 96 : index
    %c0_33 = arith.constant 0 : index
    %109 = vector.load %arg9[%c96, %c0_33] : memref<144x256xbf16, #tpu.memory_space<vmem>>, vector<16x256xbf16>
    tpu.vector_store %arg9[%c96, %c0_33], %108 {strides = array<i32>} : memref<144x256xbf16, #tpu.memory_space<vmem>>, vector<16x256xbf16>,
    %c240_i32 = arith.constant 240 : i32
    %110 = tpu.dynamic_rotate %74 by %c240_i32 dim 1 : vector<16x256xf32>, i32 -> vector<16x256xf32>
    %111 = vector.broadcast %15 : vector<1x256xf32> to vector<16x256xf32>
    %112 = arith.mulf %110, %111 : vector<16x256xf32>
    %113 = arith.truncf %112 : vector<16x256xf32> to vector<16x256xbf16>
    %c112 = arith.constant 112 : index
    %c0_34 = arith.constant 0 : index
    %114 = vector.load %arg9[%c112, %c0_34] : memref<144x256xbf16, #tpu.memory_space<vmem>>, vector<16x256xbf16>
    tpu.vector_store %arg9[%c112, %c0_34], %113 {strides = array<i32>} : memref<144x256xbf16, #tpu.memory_space<vmem>>, vector<16x256xbf16>,
    %c239_i32 = arith.constant 239 : i32
    %115 = tpu.dynamic_rotate %74 by %c239_i32 dim 1 : vector<16x256xf32>, i32 -> vector<16x256xf32>
    %116 = vector.broadcast %16 : vector<1x256xf32> to vector<16x256xf32>
    %117 = arith.mulf %115, %116 : vector<16x256xf32>
    %118 = arith.truncf %117 : vector<16x256xf32> to vector<16x256xbf16>
    %c128 = arith.constant 128 : index
    %c0_35 = arith.constant 0 : index
    %119 = vector.load %arg9[%c128, %c0_35] : memref<144x256xbf16, #tpu.memory_space<vmem>>, vector<16x256xbf16>
    tpu.vector_store %arg9[%c128, %c0_35], %118 {strides = array<i32>} : memref<144x256xbf16, #tpu.memory_space<vmem>>, vector<16x256xbf16>,
    %c0_36 = arith.constant 0 : index
    %c0_37 = arith.constant 0 : index
    %120 = vector.load %arg9[%c0_36, %c0_37] : memref<144x256xbf16, #tpu.memory_space<vmem>>, vector<144x256xbf16>
    %cst_38 = arith.constant dense<0.000000e+00> : vector<16x256xf32>
    %121 = tpu.matmul %18, %120, %cst_38 {dimension_numbers = #tpu.dot_dimension_numbers<[1], [0], [0], [1], [0, 0, 1, 1], [], []>} : vector<16x144xbf16>, vector<144x256xbf16>, vector<16x256xf32> -> vector<16x256xf32>
    %122 = vector.broadcast %5 : vector<16x1xf32> to vector<16x256xf32>
    %123 = arith.addf %121, %122 : vector<16x256xf32>
    %124 = arith.addf %123, %75 : vector<16x256xf32>
    %125 = arith.truncf %71 : vector<8x256xf32> to vector<8x256xbf16>
    %cst_39 = arith.constant dense<0.000000e+00> : vector<16x256xf32>
    %126 = tpu.matmul %19, %125, %cst_39 {dimension_numbers = #tpu.dot_dimension_numbers<[1], [0], [0], [1], [0, 0, 1, 1], [], []>} : vector<16x8xbf16>, vector<8x256xbf16>, vector<16x256xf32> -> vector<16x256xf32>
    %cst_40 = arith.constant dense<0.000000e+00> : vector<16xf32>
    %127 = vector.multi_reduction <add>, %124, %cst_40 [1] : vector<16x256xf32> to vector<16xf32>
    %128 = vector.shape_cast %127 : vector<16xf32> to vector<16x1xf32>
    %cst_41 = arith.constant 3.906250e-03 : f32
    %129 = vector.broadcast %cst_41 : f32 to vector<16x1xf32>
    %130 = arith.mulf %128, %129 : vector<16x1xf32>
    %cst_42 = arith.constant dense<0.000000e+00> : vector<16xf32>
    %131 = vector.multi_reduction <add>, %126, %cst_42 [1] : vector<16x256xf32> to vector<16xf32>
    %132 = vector.shape_cast %131 : vector<16xf32> to vector<16x1xf32>
    %cst_43 = arith.constant 3.906250e-03 : f32
    %133 = vector.broadcast %cst_43 : f32 to vector<16x1xf32>
    %134 = arith.mulf %132, %133 : vector<16x1xf32>
    %135 = vector.shape_cast %130 : vector<16x1xf32> to vector<1x16x1xf32>
    %cst_44 = arith.constant dense<0xFF800000> : vector<1xf32>
    %136 = vector.multi_reduction <maximumf>, %135, %cst_44 [1, 2] : vector<1x16x1xf32> to vector<1xf32>
    %137 = vector.shape_cast %136 : vector<1xf32> to vector<1x1x1xf32>
    %138 = vector.extract %137[0, 0, 0] : f32 from vector<1x1x1xf32>
    %139 = vector.broadcast %138 : f32 to vector<1x1xf32>
    %140 = vector.shape_cast %134 : vector<16x1xf32> to vector<1x16x1xf32>
    %cst_45 = arith.constant dense<0xFF800000> : vector<1xf32>
    %141 = vector.multi_reduction <maximumf>, %140, %cst_45 [1, 2] : vector<1x16x1xf32> to vector<1xf32>
    %142 = vector.shape_cast %141 : vector<1xf32> to vector<1x1x1xf32>
    %143 = vector.extract %142[0, 0, 0] : f32 from vector<1x1x1xf32>
    %144 = vector.broadcast %143 : f32 to vector<1x1xf32>
    %145 = arith.maximumf %139, %144 : vector<1x1xf32>
    %146 = vector.broadcast %145 : vector<1x1xf32> to vector<16x1xf32>
    %147 = arith.subf %130, %146 : vector<16x1xf32>
    %148 = math.exp %147 : vector<16x1xf32>
    %149 = vector.broadcast %145 : vector<1x1xf32> to vector<16x1xf32>
    %150 = arith.subf %134, %149 : vector<16x1xf32>
    %151 = math.exp %150 : vector<16x1xf32>
    %152 = vector.shape_cast %148 : vector<16x1xf32> to vector<1x16x1xf32>
    %cst_46 = arith.constant dense<0.000000e+00> : vector<1xf32>
    %153 = vector.multi_reduction <add>, %152, %cst_46 [1, 2] : vector<1x16x1xf32> to vector<1xf32>
    %154 = vector.shape_cast %153 : vector<1xf32> to vector<1x1x1xf32>
    %155 = vector.extract %154[0, 0, 0] : f32 from vector<1x1x1xf32>
    %156 = vector.broadcast %155 : f32 to vector<1x1xf32>
    %157 = vector.shape_cast %151 : vector<16x1xf32> to vector<1x16x1xf32>
    %cst_47 = arith.constant dense<0.000000e+00> : vector<1xf32>
    %158 = vector.multi_reduction <add>, %157, %cst_47 [1, 2] : vector<1x16x1xf32> to vector<1xf32>
    %159 = vector.shape_cast %158 : vector<1xf32> to vector<1x1x1xf32>
    %160 = vector.extract %159[0, 0, 0] : f32 from vector<1x1x1xf32>
    %161 = vector.broadcast %160 : f32 to vector<1x1xf32>
    %162 = arith.addf %156, %161 : vector<1x1xf32>
    %163 = tpu.reciprocal %162 : vector<1x1xf32> -> vector<1x1xf32>
    %164 = vector.broadcast %163 : vector<1x1xf32> to vector<16x1xf32>
    %165 = arith.mulf %148, %164 : vector<16x1xf32>
    %166 = vector.broadcast %165 : vector<16x1xf32> to vector<16x256xf32>
    %167 = arith.mulf %166, %124 : vector<16x256xf32>
    %168 = vector.broadcast %163 : vector<1x1xf32> to vector<16x1xf32>
    %169 = arith.mulf %151, %168 : vector<16x1xf32>
    %170 = vector.broadcast %169 : vector<16x1xf32> to vector<16x256xf32>
    %171 = arith.mulf %170, %126 : vector<16x256xf32>
    %172 = arith.addf %167, %171 : vector<16x256xf32>
    %c0_48 = arith.constant 0 : index
    %c0_49 = arith.constant 0 : index
    %c0_50 = arith.constant 0 : index
    %173 = vector.load %arg8[%c0_48, %c0_49, %c0_50] : memref<2x16x256xf32, #tpu.memory_space<vmem>>, vector<1x16x256xf32>
    %174 = vector.shape_cast %173 : vector<1x16x256xf32> to vector<16x256xf32>
    %175 = vector.shape_cast %172 : vector<16x256xf32> to vector<1x16x256xf32>
    tpu.vector_store %arg8[%c0_48, %c0_49, %c0_50], %175 {strides = array<i32>} : memref<2x16x256xf32, #tpu.memory_space<vmem>>, vector<1x16x256xf32>,
    %c1 = arith.constant 1 : index
    %c0_51 = arith.constant 0 : index
    %c0_52 = arith.constant 0 : index
    %176 = vector.load %arg1[%c1, %c0_51, %c0_52] : memref<2x16x256xf32, #tpu.memory_space<vmem>>, vector<1x16x256xf32>
    %177 = vector.shape_cast %176 : vector<1x16x256xf32> to vector<16x256xf32>
    %cst_53 = arith.constant dense<0.000000e+00> : vector<16xf32>
    %178 = vector.multi_reduction <add>, %177, %cst_53 [1] : vector<16x256xf32> to vector<16xf32>
    %179 = vector.shape_cast %178 : vector<16xf32> to vector<16x1xf32>
    %180 = arith.mulf %177, %177 : vector<16x256xf32>
    %cst_54 = arith.constant dense<0.000000e+00> : vector<16xf32>
    %181 = vector.multi_reduction <add>, %180, %cst_54 [1] : vector<16x256xf32> to vector<16xf32>
    %182 = vector.shape_cast %181 : vector<16xf32> to vector<16x1xf32>
    %183 = tpu.concatenate %179, %182 in 1 : vector<16x1xf32>, vector<16x1xf32> -> vector<16x2xf32>
    %cst_55 = arith.constant dense<0.000000e+00> : vector<4x2xf32>
    %184 = tpu.matmul %0, %183, %cst_55 {dimension_numbers = #tpu.dot_dimension_numbers<[1], [0], [0], [1], [0, 0, 1, 1], [], []>} : vector<4x16xf32>, vector<16x2xf32>, vector<4x2xf32> -> vector<4x2xf32>
    %185 = vector.extract_strided_slice %184 {offsets = [0, 0], sizes = [4, 1], strides = [1, 1]} : vector<4x2xf32> to vector<4x1xf32>
    %cst_56 = arith.constant 9.765625E-4 : f32
    %186 = vector.broadcast %cst_56 : f32 to vector<4x1xf32>
    %187 = arith.mulf %185, %186 : vector<4x1xf32>
    %188 = vector.extract_strided_slice %184 {offsets = [0, 1], sizes = [4, 1], strides = [1, 1]} : vector<4x2xf32> to vector<4x1xf32>
    %cst_57 = arith.constant 9.765625E-4 : f32
    %189 = vector.broadcast %cst_57 : f32 to vector<4x1xf32>
    %190 = arith.mulf %188, %189 : vector<4x1xf32>
    %191 = arith.mulf %187, %187 : vector<4x1xf32>
    %192 = arith.subf %190, %191 : vector<4x1xf32>
    %cst_58 = arith.constant 9.99999974E-6 : f32
    %193 = vector.broadcast %cst_58 : f32 to vector<4x1xf32>
    %194 = arith.addf %192, %193 : vector<4x1xf32>
    %195 = math.rsqrt %194 : vector<4x1xf32>
    %196 = tpu.concatenate %187, %195 in 1 : vector<4x1xf32>, vector<4x1xf32> -> vector<4x2xf32>
    %cst_59 = arith.constant dense<0.000000e+00> : vector<16x2xf32>
    %197 = tpu.matmul %6, %196, %cst_59 {dimension_numbers = #tpu.dot_dimension_numbers<[1], [0], [0], [1], [0, 0, 1, 1], [], []>} : vector<16x4xf32>, vector<4x2xf32>, vector<16x2xf32> -> vector<16x2xf32>
    %198 = vector.extract_strided_slice %197 {offsets = [0, 1], sizes = [16, 1], strides = [1, 1]} : vector<16x2xf32> to vector<16x1xf32>
    %199 = arith.mulf %198, %2 : vector<16x1xf32>
    %200 = vector.extract_strided_slice %197 {offsets = [0, 0], sizes = [16, 1], strides = [1, 1]} : vector<16x2xf32> to vector<16x1xf32>
    %201 = arith.mulf %200, %199 : vector<16x1xf32>
    %202 = arith.subf %3, %201 : vector<16x1xf32>
    %203 = arith.mulf %199, %4 : vector<16x1xf32>
    %204 = vector.broadcast %203 : vector<16x1xf32> to vector<16x256xf32>
    %205 = arith.mulf %177, %204 : vector<16x256xf32>
    %206 = arith.mulf %202, %4 : vector<16x1xf32>
    %207 = vector.broadcast %206 : vector<16x1xf32> to vector<16x256xf32>
    %208 = arith.addf %205, %207 : vector<16x256xf32>
    %cst_60 = arith.constant 5.000000e-01 : f32
    %209 = vector.broadcast %cst_60 : f32 to vector<16x256xf32>
    %210 = arith.mulf %209, %208 : vector<16x256xf32>
    %211 = math.tanh %210 : vector<16x256xf32>
    %cst_61 = arith.constant 5.000000e-01 : f32
    %212 = vector.broadcast %cst_61 : f32 to vector<16x256xf32>
    %213 = arith.mulf %212, %211 : vector<16x256xf32>
    %cst_62 = arith.constant 5.000000e-01 : f32
    %214 = vector.broadcast %cst_62 : f32 to vector<16x256xf32>
    %215 = arith.addf %213, %214 : vector<16x256xf32>
    %cst_63 = arith.constant 5.000000e-01 : f32
    %216 = vector.broadcast %cst_63 : f32 to vector<16x256xf32>
    %217 = arith.cmpf ogt, %215, %216 : vector<16x256xf32>
    %218 = arith.mulf %215, %177 : vector<16x256xf32>
    %219 = arith.select %217, %177, %218 : vector<16x256xi1>, vector<16x256xf32>
    %cst_64 = arith.constant 0.000000e+00 : f32
    %220 = vector.broadcast %cst_64 : f32 to vector<16x256xf32>
    %221 = arith.select %217, %220, %218 : vector<16x256xi1>, vector<16x256xf32>
    %222 = vector.extract_strided_slice %219 {offsets = [0, 0], sizes = [8, 256], strides = [1, 1]} : vector<16x256xf32> to vector<8x256xf32>
    %223 = vector.extract_strided_slice %221 {offsets = [8, 0], sizes = [8, 256], strides = [1, 1]} : vector<16x256xf32> to vector<8x256xf32>
    %224 = arith.addf %222, %223 : vector<8x256xf32>
    %225 = vector.extract_strided_slice %219 {offsets = [8, 0], sizes = [8, 256], strides = [1, 1]} : vector<16x256xf32> to vector<8x256xf32>
    %226 = vector.extract_strided_slice %221 {offsets = [0, 0], sizes = [8, 256], strides = [1, 1]} : vector<16x256xf32> to vector<8x256xf32>
    %227 = arith.addf %225, %226 : vector<8x256xf32>
    %228 = arith.truncf %224 : vector<8x256xf32> to vector<8x256xbf16>
    %cst_65 = arith.constant dense<0.000000e+00> : vector<32x256xf32>
    %229 = tpu.matmul %17, %228, %cst_65 {dimension_numbers = #tpu.dot_dimension_numbers<[1], [0], [0], [1], [0, 0, 1, 1], [], []>} : vector<32x8xbf16>, vector<8x256xbf16>, vector<32x256xf32> -> vector<32x256xf32>
    %230 = vector.extract_strided_slice %229 {offsets = [0, 0], sizes = [16, 256], strides = [1, 1]} : vector<32x256xf32> to vector<16x256xf32>
    %231 = vector.extract_strided_slice %229 {offsets = [16, 0], sizes = [16, 256], strides = [1, 1]} : vector<32x256xf32> to vector<16x256xf32>
    %c17_i32_66 = arith.constant 17 : i32
    %232 = tpu.dynamic_rotate %230 by %c17_i32_66 dim 1 : vector<16x256xf32>, i32 -> vector<16x256xf32>
    %233 = vector.broadcast %8 : vector<1x256xf32> to vector<16x256xf32>
    %234 = arith.mulf %232, %233 : vector<16x256xf32>
    %235 = arith.truncf %234 : vector<16x256xf32> to vector<16x256xbf16>
    %c0_67 = arith.constant 0 : index
    %c0_68 = arith.constant 0 : index
    %236 = vector.load %arg9[%c0_67, %c0_68] : memref<144x256xbf16, #tpu.memory_space<vmem>>, vector<16x256xbf16>
    tpu.vector_store %arg9[%c0_67, %c0_68], %235 {strides = array<i32>} : memref<144x256xbf16, #tpu.memory_space<vmem>>, vector<16x256xbf16>,
    %c16_i32_69 = arith.constant 16 : i32
    %237 = tpu.dynamic_rotate %230 by %c16_i32_69 dim 1 : vector<16x256xf32>, i32 -> vector<16x256xf32>
    %238 = vector.broadcast %9 : vector<1x256xf32> to vector<16x256xf32>
    %239 = arith.mulf %237, %238 : vector<16x256xf32>
    %240 = arith.truncf %239 : vector<16x256xf32> to vector<16x256xbf16>
    %c16_70 = arith.constant 16 : index
    %c0_71 = arith.constant 0 : index
    %241 = vector.load %arg9[%c16_70, %c0_71] : memref<144x256xbf16, #tpu.memory_space<vmem>>, vector<16x256xbf16>
    tpu.vector_store %arg9[%c16_70, %c0_71], %240 {strides = array<i32>} : memref<144x256xbf16, #tpu.memory_space<vmem>>, vector<16x256xbf16>,
    %c15_i32_72 = arith.constant 15 : i32
    %242 = tpu.dynamic_rotate %230 by %c15_i32_72 dim 1 : vector<16x256xf32>, i32 -> vector<16x256xf32>
    %243 = vector.broadcast %10 : vector<1x256xf32> to vector<16x256xf32>
    %244 = arith.mulf %242, %243 : vector<16x256xf32>
    %245 = arith.truncf %244 : vector<16x256xf32> to vector<16x256xbf16>
    %c32_73 = arith.constant 32 : index
    %c0_74 = arith.constant 0 : index
    %246 = vector.load %arg9[%c32_73, %c0_74] : memref<144x256xbf16, #tpu.memory_space<vmem>>, vector<16x256xbf16>
    tpu.vector_store %arg9[%c32_73, %c0_74], %245 {strides = array<i32>} : memref<144x256xbf16, #tpu.memory_space<vmem>>, vector<16x256xbf16>,
    %c1_i32_75 = arith.constant 1 : i32
    %247 = tpu.dynamic_rotate %230 by %c1_i32_75 dim 1 : vector<16x256xf32>, i32 -> vector<16x256xf32>
    %248 = vector.broadcast %11 : vector<1x256xf32> to vector<16x256xf32>
    %249 = arith.mulf %247, %248 : vector<16x256xf32>
    %250 = arith.truncf %249 : vector<16x256xf32> to vector<16x256xbf16>
    %c48_76 = arith.constant 48 : index
    %c0_77 = arith.constant 0 : index
    %251 = vector.load %arg9[%c48_76, %c0_77] : memref<144x256xbf16, #tpu.memory_space<vmem>>, vector<16x256xbf16>
    tpu.vector_store %arg9[%c48_76, %c0_77], %250 {strides = array<i32>} : memref<144x256xbf16, #tpu.memory_space<vmem>>, vector<16x256xbf16>,
    %252 = vector.broadcast %12 : vector<1x256xf32> to vector<16x256xf32>
    %253 = arith.mulf %230, %252 : vector<16x256xf32>
    %254 = arith.truncf %253 : vector<16x256xf32> to vector<16x256xbf16>
    %c64_78 = arith.constant 64 : index
    %c0_79 = arith.constant 0 : index
    %255 = vector.load %arg9[%c64_78, %c0_79] : memref<144x256xbf16, #tpu.memory_space<vmem>>, vector<16x256xbf16>
    tpu.vector_store %arg9[%c64_78, %c0_79], %254 {strides = array<i32>} : memref<144x256xbf16, #tpu.memory_space<vmem>>, vector<16x256xbf16>,
    %c255_i32_80 = arith.constant 255 : i32
    %256 = tpu.dynamic_rotate %230 by %c255_i32_80 dim 1 : vector<16x256xf32>, i32 -> vector<16x256xf32>
    %257 = vector.broadcast %13 : vector<1x256xf32> to vector<16x256xf32>
    %258 = arith.mulf %256, %257 : vector<16x256xf32>
    %259 = arith.truncf %258 : vector<16x256xf32> to vector<16x256xbf16>
    %c80_81 = arith.constant 80 : index
    %c0_82 = arith.constant 0 : index
    %260 = vector.load %arg9[%c80_81, %c0_82] : memref<144x256xbf16, #tpu.memory_space<vmem>>, vector<16x256xbf16>
    tpu.vector_store %arg9[%c80_81, %c0_82], %259 {strides = array<i32>} : memref<144x256xbf16, #tpu.memory_space<vmem>>, vector<16x256xbf16>,
    %c241_i32_83 = arith.constant 241 : i32
    %261 = tpu.dynamic_rotate %230 by %c241_i32_83 dim 1 : vector<16x256xf32>, i32 -> vector<16x256xf32>
    %262 = vector.broadcast %14 : vector<1x256xf32> to vector<16x256xf32>
    %263 = arith.mulf %261, %262 : vector<16x256xf32>
    %264 = arith.truncf %263 : vector<16x256xf32> to vector<16x256xbf16>
    %c96_84 = arith.constant 96 : index
    %c0_85 = arith.constant 0 : index
    %265 = vector.load %arg9[%c96_84, %c0_85] : memref<144x256xbf16, #tpu.memory_space<vmem>>, vector<16x256xbf16>
    tpu.vector_store %arg9[%c96_84, %c0_85], %264 {strides = array<i32>} : memref<144x256xbf16, #tpu.memory_space<vmem>>, vector<16x256xbf16>,
    %c240_i32_86 = arith.constant 240 : i32
    %266 = tpu.dynamic_rotate %230 by %c240_i32_86 dim 1 : vector<16x256xf32>, i32 -> vector<16x256xf32>
    %267 = vector.broadcast %15 : vector<1x256xf32> to vector<16x256xf32>
    %268 = arith.mulf %266, %267 : vector<16x256xf32>
    %269 = arith.truncf %268 : vector<16x256xf32> to vector<16x256xbf16>
    %c112_87 = arith.constant 112 : index
    %c0_88 = arith.constant 0 : index
    %270 = vector.load %arg9[%c112_87, %c0_88] : memref<144x256xbf16, #tpu.memory_space<vmem>>, vector<16x256xbf16>
    tpu.vector_store %arg9[%c112_87, %c0_88], %269 {strides = array<i32>} : memref<144x256xbf16, #tpu.memory_space<vmem>>, vector<16x256xbf16>,
    %c239_i32_89 = arith.constant 239 : i32
    %271 = tpu.dynamic_rotate %230 by %c239_i32_89 dim 1 : vector<16x256xf32>, i32 -> vector<16x256xf32>
    %272 = vector.broadcast %16 : vector<1x256xf32> to vector<16x256xf32>
    %273 = arith.mulf %271, %272 : vector<16x256xf32>
    %274 = arith.truncf %273 : vector<16x256xf32> to vector<16x256xbf16>
    %c128_90 = arith.constant 128 : index
    %c0_91 = arith.constant 0 : index
    %275 = vector.load %arg9[%c128_90, %c0_91] : memref<144x256xbf16, #tpu.memory_space<vmem>>, vector<16x256xbf16>
    tpu.vector_store %arg9[%c128_90, %c0_91], %274 {strides = array<i32>} : memref<144x256xbf16, #tpu.memory_space<vmem>>, vector<16x256xbf16>,
    %c0_92 = arith.constant 0 : index
    %c0_93 = arith.constant 0 : index
    %276 = vector.load %arg9[%c0_92, %c0_93] : memref<144x256xbf16, #tpu.memory_space<vmem>>, vector<144x256xbf16>
    %cst_94 = arith.constant dense<0.000000e+00> : vector<16x256xf32>
    %277 = tpu.matmul %18, %276, %cst_94 {dimension_numbers = #tpu.dot_dimension_numbers<[1], [0], [0], [1], [0, 0, 1, 1], [], []>} : vector<16x144xbf16>, vector<144x256xbf16>, vector<16x256xf32> -> vector<16x256xf32>
    %278 = vector.broadcast %5 : vector<16x1xf32> to vector<16x256xf32>
    %279 = arith.addf %277, %278 : vector<16x256xf32>
    %280 = arith.addf %279, %231 : vector<16x256xf32>
    %281 = arith.truncf %227 : vector<8x256xf32> to vector<8x256xbf16>
    %cst_95 = arith.constant dense<0.000000e+00> : vector<16x256xf32>
    %282 = tpu.matmul %19, %281, %cst_95 {dimension_numbers = #tpu.dot_dimension_numbers<[1], [0], [0], [1], [0, 0, 1, 1], [], []>} : vector<16x8xbf16>, vector<8x256xbf16>, vector<16x256xf32> -> vector<16x256xf32>
    %cst_96 = arith.constant dense<0.000000e+00> : vector<16xf32>
    %283 = vector.multi_reduction <add>, %280, %cst_96 [1] : vector<16x256xf32> to vector<16xf32>
    %284 = vector.shape_cast %283 : vector<16xf32> to vector<16x1xf32>
    %cst_97 = arith.constant 3.906250e-03 : f32
    %285 = vector.broadcast %cst_97 : f32 to vector<16x1xf32>
    %286 = arith.mulf %284, %285 : vector<16x1xf32>
    %cst_98 = arith.constant dense<0.000000e+00> : vector<16xf32>
    %287 = vector.multi_reduction <add>, %282, %cst_98 [1] : vector<16x256xf32> to vector<16xf32>
    %288 = vector.shape_cast %287 : vector<16xf32> to vector<16x1xf32>
    %cst_99 = arith.constant 3.906250e-03 : f32
    %289 = vector.broadcast %cst_99 : f32 to vector<16x1xf32>
    %290 = arith.mulf %288, %289 : vector<16x1xf32>
    %291 = vector.shape_cast %286 : vector<16x1xf32> to vector<1x16x1xf32>
    %cst_100 = arith.constant dense<0xFF800000> : vector<1xf32>
    %292 = vector.multi_reduction <maximumf>, %291, %cst_100 [1, 2] : vector<1x16x1xf32> to vector<1xf32>
    %293 = vector.shape_cast %292 : vector<1xf32> to vector<1x1x1xf32>
    %294 = vector.extract %293[0, 0, 0] : f32 from vector<1x1x1xf32>
    %295 = vector.broadcast %294 : f32 to vector<1x1xf32>
    %296 = vector.shape_cast %290 : vector<16x1xf32> to vector<1x16x1xf32>
    %cst_101 = arith.constant dense<0xFF800000> : vector<1xf32>
    %297 = vector.multi_reduction <maximumf>, %296, %cst_101 [1, 2] : vector<1x16x1xf32> to vector<1xf32>
    %298 = vector.shape_cast %297 : vector<1xf32> to vector<1x1x1xf32>
    %299 = vector.extract %298[0, 0, 0] : f32 from vector<1x1x1xf32>
    %300 = vector.broadcast %299 : f32 to vector<1x1xf32>
    %301 = arith.maximumf %295, %300 : vector<1x1xf32>
    %302 = vector.broadcast %301 : vector<1x1xf32> to vector<16x1xf32>
    %303 = arith.subf %286, %302 : vector<16x1xf32>
    %304 = math.exp %303 : vector<16x1xf32>
    %305 = vector.broadcast %301 : vector<1x1xf32> to vector<16x1xf32>
    %306 = arith.subf %290, %305 : vector<16x1xf32>
    %307 = math.exp %306 : vector<16x1xf32>
    %308 = vector.shape_cast %304 : vector<16x1xf32> to vector<1x16x1xf32>
    %cst_102 = arith.constant dense<0.000000e+00> : vector<1xf32>
    %309 = vector.multi_reduction <add>, %308, %cst_102 [1, 2] : vector<1x16x1xf32> to vector<1xf32>
    %310 = vector.shape_cast %309 : vector<1xf32> to vector<1x1x1xf32>
    %311 = vector.extract %310[0, 0, 0] : f32 from vector<1x1x1xf32>
    %312 = vector.broadcast %311 : f32 to vector<1x1xf32>
    %313 = vector.shape_cast %307 : vector<16x1xf32> to vector<1x16x1xf32>
    %cst_103 = arith.constant dense<0.000000e+00> : vector<1xf32>
    %314 = vector.multi_reduction <add>, %313, %cst_103 [1, 2] : vector<1x16x1xf32> to vector<1xf32>
    %315 = vector.shape_cast %314 : vector<1xf32> to vector<1x1x1xf32>
    %316 = vector.extract %315[0, 0, 0] : f32 from vector<1x1x1xf32>
    %317 = vector.broadcast %316 : f32 to vector<1x1xf32>
    %318 = arith.addf %312, %317 : vector<1x1xf32>
    %319 = tpu.reciprocal %318 : vector<1x1xf32> -> vector<1x1xf32>
    %320 = vector.broadcast %319 : vector<1x1xf32> to vector<16x1xf32>
    %321 = arith.mulf %304, %320 : vector<16x1xf32>
    %322 = vector.broadcast %321 : vector<16x1xf32> to vector<16x256xf32>
    %323 = arith.mulf %322, %280 : vector<16x256xf32>
    %324 = vector.broadcast %319 : vector<1x1xf32> to vector<16x1xf32>
    %325 = arith.mulf %307, %324 : vector<16x1xf32>
    %326 = vector.broadcast %325 : vector<16x1xf32> to vector<16x256xf32>
    %327 = arith.mulf %326, %282 : vector<16x256xf32>
    %328 = arith.addf %323, %327 : vector<16x256xf32>
    %c1_104 = arith.constant 1 : index
    %c0_105 = arith.constant 0 : index
    %c0_106 = arith.constant 0 : index
    %329 = vector.load %arg8[%c1_104, %c0_105, %c0_106] : memref<2x16x256xf32, #tpu.memory_space<vmem>>, vector<1x16x256xf32>
    %330 = vector.shape_cast %329 : vector<1x16x256xf32> to vector<16x256xf32>
    %331 = vector.shape_cast %328 : vector<16x256xf32> to vector<1x16x256xf32>
    tpu.vector_store %arg8[%c1_104, %c0_105, %c0_106], %331 {strides = array<i32>} : memref<2x16x256xf32, #tpu.memory_space<vmem>>, vector<1x16x256xf32>,
    return
  }
  func.func @transform_0(%arg0: i32) -> (i32, i32, i32) {
    %c0_i32 = arith.constant 0 : i32
    %c0_i32_0 = arith.constant 0 : i32
    %c0_i32_1 = arith.constant 0 : i32
    return %arg0, %c0_i32, %c0_i32_0 : i32, i32, i32
  }
  func.func @transform_1(%arg0: i32) -> (i32, i32) {
    %c0_i32 = arith.constant 0 : i32
    %c0_i32_0 = arith.constant 0 : i32
    %c0_i32_1 = arith.constant 0 : i32
    return %c0_i32, %c0_i32_0 : i32, i32
  }
  func.func @transform_2(%arg0: i32) -> (i32, i32) {
    %c0_i32 = arith.constant 0 : i32
    %c0_i32_0 = arith.constant 0 : i32
    %c0_i32_1 = arith.constant 0 : i32
    return %c0_i32, %c0_i32_0 : i32, i32
  }
  func.func @transform_3(%arg0: i32) -> (i32, i32) {
    %c0_i32 = arith.constant 0 : i32
    %c0_i32_0 = arith.constant 0 : i32
    %c0_i32_1 = arith.constant 0 : i32
    return %c0_i32, %c0_i32_0 : i32, i32
  }
  func.func @transform_4(%arg0: i32) -> (i32, i32) {
    %c0_i32 = arith.constant 0 : i32
    %c0_i32_0 = arith.constant 0 : i32
    %c0_i32_1 = arith.constant 0 : i32
    return %c0_i32, %c0_i32_0 : i32, i32
  }
  func.func @transform_5(%arg0: i32) -> (i32, i32) {
    %c0_i32 = arith.constant 0 : i32
    %c0_i32_0 = arith.constant 0 : i32
    %c0_i32_1 = arith.constant 0 : i32
    return %c0_i32, %c0_i32_0 : i32, i32
  }
  func.func @transform_6(%arg0: i32) -> (i32, i32) {
    %c0_i32 = arith.constant 0 : i32
    %c0_i32_0 = arith.constant 0 : i32
    %c0_i32_1 = arith.constant 0 : i32
    return %c0_i32, %c0_i32_0 : i32, i32
  }
  func.func @transform_7(%arg0: i32) -> (i32, i32, i32) {
    %c0_i32 = arith.constant 0 : i32
    %c0_i32_0 = arith.constant 0 : i32
    %c0_i32_1 = arith.constant 0 : i32
    return %arg0, %c0_i32, %c0_i32_0 : i32, i32, i32
  }
}

</mosaic_0001>

<bundles_post_ra>
// kernel: tpu_custom_call.1
= control target key start
LH: loop header
LB: loop body
LE: loop exit
PB: predicated region body
PF: predicated region fallthrough
CT: control target
= control target key end

     0   :  { %12 = vsyncpa [#allocation4], 0  ;;  %s2747_s0 = inlined_call_operand.hbm [shape: f32[2,16,256], index: 0, kind: input, shape index: {}]   ;;  %s2748_s1 = inlined_call_operand.vmem [shape: f32[4,16], index: 1, kind: input, shape index: {}]   ;;  %s2749_s2 = inlined_call_operand.vmem [shape: f32[16,8], index: 2, kind: input, shape index: {}]   ;;  %s2750_s3 = inlined_call_operand.vmem [shape: f32[9,256], index: 3, kind: input, shape index: {}]   ;;  %s2751_s4 = inlined_call_operand.vmem [shape: bf16[32,8], index: 4, kind: input, shape index: {}]   ;;  %s2752_s5 = inlined_call_operand.vmem [shape: bf16[16,144], index: 5, kind: input, shape index: {}]   ;;  %s2753_s6 = inlined_call_operand.vmem [shape: bf16[16,8], index: 6, kind: input, shape index: {}]   ;;  %s2754_s7 = inlined_call_operand.hbm [shape: f32[2,16,256], index: 7, kind: output, shape index: {}]  }
   0x1   :  { %13 = vsyncpa [#allocation5], 0  ;;  %s1872_s24 = smov [#allocation3]   ;;  %s1824_s28 = scalar_lea.hbm %s2747_s0, 1024 }
   0x2   :  { %s19_s25 = sshll.u32 %s1872_s24, 4  ;;  %p1825_p0 = scmp.ne.s32.totalorder %s2747_s0, %s1824_s28  ;;  %s20_s25 = int_to_ptr.vmem [resolvable:$true] %s19_s25 }
   0x3   :  { %p1828_p1 = scmp.lt.u32.totalorder %s1824_s28, %s2747_s0 }
   0x5   :  { %p1830_p2 = pnand %p1828_p1, %p1825_p0 }
   0x7   :  { %1833 = shalt.err (!%p1830_p2)
}
   0x8   :  { %s1834_s10 = scalar_lea.vmem %s20_s25, 1024  ;;  %p1839_p4 = scmp.lt.s32.totalorder %s20_s25, %s20_s25 }
   0x9   :  { %p1835_p3 = scmp.ne.s32.totalorder %s20_s25, %s1834_s10  ;;  %p1840_p5 = scmp.lt.s32.totalorder %s1834_s10, %s1834_s10 }
   0xb   :  { %p1841_p6 = por %p1840_p5, %p1839_p4 }
   0xd   :  { %p1842_p7 = pnand %p1841_p6, %p1835_p3 }
   0xf   :  { %1845 = shalt.err (!%p1842_p7)
}
  0x10   :  { %s1873_s11 = smov 256   ;;  %s1874_s12 = smov 16  }
  0x11   :  { %25 = dma.hbm_to_vmem [thread:$0]  %s2747_s0, 1024, %s20_s25, [#allocation4], %s1873_s11, %s1873_s11, %s1874_s12  }
  0x12   :  { %1868 = dma.done.wait [#allocation4], 1024  }
  0x13   :  { %1869 = vsyncadd [#allocation4], 4294966272  ;;  %v1945_v0 = vld [vmem:[#allocation3] sm:$0xff]  ;;  %v1947_v1 = vld [vmem:[#allocation3 + $0x8] sm:$0xff]  ;;  %v1875_v12 = vmov 0.0|0.0   ;;  %vm1876_vm0 = vmmov 0  }
  0x14   :  { %v1949_v2 = vld [vmem:[#allocation3 + $0x10] sm:$0xff]  ;;  %v67_v3 = vmul.f32 %v1945_v0, %v1945_v0  ;;  %v68_v4 = vmul.f32 %v1947_v1, %v1947_v1  ;;  %v61_v5 = vadd.f32 %v1947_v1, %v1945_v0  ;;  %v1957_v6 = vld [vmem:[#allocation3 + $0x18] sm:$0xff]  ;;  %1715 = vmatprep.subr.bf16.mxu1 %v1875_v12  ;;  %v1877_v13 = vmov 0.0   ;;  %v1973_v21 = vld [vmem:[%s2748_s1] sm:$0xf]  ;;  %s1878_s18 = smov 124  }
  0x15   :  { %v69_v7 = vmul.f32 %v1949_v2, %v1949_v2  ;;  %v70_v8 = vmul.f32 %v1957_v6, %v1957_v6  ;;  %v64_v10 = vadd.f32 %v1957_v6, %v1949_v2  ;;  %1695 = vmatprep.mubr.msk.f32.mxu1 %vm1876_vm0, %v1877_v13  ;;  %vm77_vm1 = vcmask 7168   ;;  %v1980_v22 = vld [vmem:[%s2749_s2] sm:$0xff]  ;;  %v1986_v23 = vld [vmem:[%s2749_s2 + $0x8] sm:$0xff]  ;;  %s1879_s1 = smov 1   ;;  %s1880_s21 = smov 127   ;;  %v2041_v61 = vld [vmem:[#allocation3 + $0x30] sm:$0xff] }
  0x16   :  { %v71_v9 = vadd.f32 %v68_v4, %v67_v3  ;;  %62 = vadd.xlane.f32.xlu0 %v61_v5  ;;  %vm80_vm2 = vcmask 130048   ;;  %vm170_vm3 = vcmask 31744   ;;  %vm175_vm4 = vcmask 1043456   ;;  %v2031_v56 = vld [vmem:[#allocation3 + $0x20] sm:$0xff]  ;;  %v2033_v57 = vld [vmem:[#allocation3 + $0x28] sm:$0xff]  ;;  %v2043_v62 = vld [vmem:[#allocation3 + $0x38] sm:$0xff] }
  0x17   :  { %v74_v11 = vadd.f32 %v70_v8, %v69_v7  ;;  %v1881_v41 = vmov 1   ;;  %v928_v58 = vadd.f32 %v2033_v57, %v2031_v56  ;;  %v934_v59 = vmul.f32 %v2031_v56, %v2031_v56  ;;  %s1883_s25 = smov 17   ;;  %s1884_s26 = smov 15  }
  0x18   :  { %72 = vadd.xlane.f32.xlu1 %v71_v9  ;;  %1772 = vset.pattern.permute.xlu0 %v1881_v41  ;;  %v935_v60 = vmul.f32 %v2033_v57, %v2033_v57  ;;  %v936_v3 = vmul.f32 %v2041_v61, %v2041_v61  ;;  %v937_v4 = vmul.f32 %v2043_v62, %v2043_v62  ;;  %v1882_v8 = vmov 0   ;;  %s1885_s8 = smov 113   ;;  %s1886_s9 = smov 112  }
  0x19   :  { %1771 = vset.pattern.permute.xlu1 %v1881_v41  ;;  %v931_v7 = vadd.f32 %v2043_v62, %v2041_v61  ;;  %817 = vmatprep.mubr.bf16.mxu0 %v1882_v8  ;;  %vm368_vm9 = vcmask 64512   ;;  %s1887_s10 = smov 111   ;;  %s1889_s28 = smov [#allocation6]  }
  0x1a   :  { %65 = vadd.xlane.f32.xlu0 %v64_v10  ;;  %v938_v63 = vadd.f32 %v935_v60, %v934_v59  ;;  %v941_v5 = vadd.f32 %v937_v4, %v936_v3  ;;  %s1640_s29 = sshll.u32 %s1889_s28, 4  ;;  %s1641_s29 = int_to_ptr.vmem [resolvable:$true] %s1640_s29 }
  0x1b   :  { %s1846_s30 = scalar_lea.vmem %s1641_s29, 1024  ;;  %p1851_p9 = scmp.lt.s32.totalorder %s1641_s29, %s1641_s29 }
  0x1c   :  { %75 = vadd.xlane.f32.xlu1 %v74_v11  ;;  %p1847_p8 = scmp.ne.s32.totalorder %s1641_s29, %s1846_s30  ;;  %p1852_p10 = scmp.lt.s32.totalorder %s1846_s30, %s1846_s30 }
  0x1e   :  { %p1853_p11 = por %p1852_p10, %p1851_p9 }
  0x20   :  { %p1854_p12 = pnand %p1853_p11, %p1847_p8 }
  0x2d   :  { %166 = vrot.lane.b32.xlu1 %v1980_v22, %s1878_s18 }
  0x31   :  { %168 = vrot.lane.b32.xlu1 %v1986_v23, %s1878_s18 }
  0x35   :  { %254 = vrot.lane.b32.xlu1 %v1980_v22, %s1879_s1 }
  0xa3   :  { %v63_v14 = vpop.xlane.xlu0 %62 }
  0xa5   :  { %v73_v15 = vpop.xlane.xlu1 %72 }
  0xa6   :  { %v78_v18 = vsel %vm77_vm1, %v63_v14, %v73_v15 }
  0xa7   :  { %v66_v16 = vpop.xlane.xlu0 %65 }
  0xa9   :  { %v76_v17 = vpop.xlane.xlu1 %75 }
  0xaa   :  { %v79_v19 = vsel %vm77_vm1, %v66_v16, %v76_v17 }
  0xab   :  { %v1716_v20 = vpack.c.bf16 %v79_v19, %v78_v18 }
  0xad   :  { %1717 = vmatpush3.bf16.msra.mxu1 %v1716_v20  ;;  %v1991_v24 = vpop.permute.xlu1 %166 }
  0xb0   :  { %1696 = vmatmul.mubr.msk.f32.vlgmr.msra.gmra.mrb[0].mxu1 %vm80_vm2, %v1973_v21 }
  0xb1   :  { %1700 = vmatprep.mubr.msk.f32.mxu1 %vm170_vm3, %v1991_v24  ;;  %v1999_v34 = vpop.permute.xlu1 %168 }
  0xb5   :  { %v2007_v36 = vpop.permute.xlu1 %254 }
 0x183   :  { %v150_v25 = vpop.f32.mrb[0].mxu1 }
 0x184   :  { %v154_v26 = vmul.f32 0.0009765625, %v150_v25  ;;  %v1697_v27 = vpop.f32.mrb[1].mxu1 }
 0x186   :  { %v155_v28 = vmul.f32 %v154_v26, %v154_v26 }
 0x188   :  { %157 = vrot.lane.b32.xlu0 %v155_v28, %s1879_s1 }
 0x18c   :  { %256 = vrot.lane.b32.xlu0 %v1986_v23, %s1879_s1 }
 0x1fa   :  { %v158_v29 = vpop.permute.xlu0 %157 }
 0x1fb   :  { %v160_v30 = vsub.f32 %v154_v26, %v158_v29 }
 0x1fd   :  { %v161_v31 = vadd.f32 1e-05, %v160_v30 }
 0x1fe   :  { %v2005_v35 = vpop.permute.xlu0 %256 }
 0x1ff   :  { %1782 = vrsqrt.f32 %v161_v31 }
 0x209   :  { %v1783_v32 = vpop.eup %1782 }
 0x20a   :  { %v163_v33 = vsel %vm77_vm1, %v154_v26, %v1783_v32 }
 0x20b   :  { %1698 = vmatprep.subr.msk.mxu1 %vm175_vm4, %v163_v33 }
 0x20c   :  { %1699 = vmatpush3.msk.msra.mxu1 %vm175_vm4, %v163_v33 }
 0x20d   :  { %1701 = vmatmul.mubr.msk.f32.vlgmr.msra.gmra.mrb[2].mxu1 %vm170_vm3, %v1999_v34 }
 0x20e   :  { %413 = vmatprep.mubr.bf16.mxu1 %v1882_v8 }
 0x2e0   :  { %v1702_v37 = vpop.f32.mrb[2].mxu1 }
 0x2e1   :  { %v261_v38 = vmul.f32 %v1702_v37, %v2005_v35  ;;  %v245_v39 = vpop.f32.mrb[3].mxu1 }
 0x2e2   :  { %v260_v40 = vmul.f32 %v2007_v36, %v245_v39 }
 0x2e3   :  { %266 = vrot.lane.b32.xlu0 %v261_v38, %s1880_s21 }
 0x2e4   :  { %264 = vrot.lane.b32.xlu1 %v260_v40, %s1880_s21 }
 0x355   :  { %v267_v42 = vpop.permute.xlu0 %266 }
 0x356   :  { %v271_v43 = vmul.f32 %v1702_v37, %v267_v42  ;;  %v265_v44 = vpop.permute.xlu1 %264 }
 0x357   :  { %v270_v45 = vmul.f32 %v265_v44, %v245_v39 }
 0x358   :  { %276 = vrot.lane.b32.xlu0 %v271_v43, %s1879_s1 }
 0x359   :  { %274 = vrot.lane.b32.xlu1 %v270_v45, %s1879_s1 }
 0x35c   :  { %284 = vrot.lane.b32.xlu0 %v1986_v23, %s1880_s21 }
 0x35d   :  { %282 = vrot.lane.b32.xlu1 %v1980_v22, %s1880_s21 }
 0x3ca   :  { %v277_v46 = vpop.permute.xlu0 %276 }
 0x3cb   :  { %v275_v47 = vpop.permute.xlu1 %274  ;;  %v281_v54 = vsub.f32 %v1986_v23, %v277_v46 }
 0x3cc   :  { %v280_v52 = vsub.f32 %v1980_v22, %v275_v47 }
 0x3ce   :  { %v2021_v48 = vpop.permute.xlu0 %284 }
 0x3cf   :  { %v2023_v49 = vpop.permute.xlu1 %282  ;;  %v289_v50 = vmul.f32 %v2021_v48, %v261_v38  ;;  %v305_v55 = vmul.f32 %v2021_v48, %v281_v54 }
 0x3d0   :  { %v288_v51 = vmul.f32 %v2023_v49, %v260_v40  ;;  %v304_v53 = vmul.f32 %v2023_v49, %v280_v52 }
 0x3d1   :  { %297 = vperm.xlu0 %1772, %v289_v50  }
 0x3d2   :  { %292 = vperm.xlu1 %1771, %v288_v51  }
 0x3d6   :  { %308 = vperm.xlu1 %1771, %v304_v53  }
 0x3da   :  { %313 = vperm.xlu1 %1771, %v305_v55  }
 0x3f0   :  { %929 = vadd.xlane.f32.xlu0 %v928_v58 }
 0x3f4   :  { %939 = vadd.xlane.f32.xlu0 %v938_v63 }
 0x3f8   :  { %942 = vadd.xlane.f32.xlu0 %v941_v5 }
 0x3fe   :  { %932 = vadd.xlane.f32.xlu1 %v931_v7 }
 0x450   :  { %v298_v14 = vpop.permute.xlu0 %297 }
 0x451   :  { %v293_v9 = vpop.permute.xlu1 %292  ;;  %v302_v18 = vmul.f32 %v298_v14, %v1949_v2  ;;  %v303_v19 = vmul.f32 %v298_v14, %v1957_v6 }
 0x452   :  { %v300_v10 = vmul.f32 %v293_v9, %v1945_v0  ;;  %v301_v11 = vmul.f32 %v293_v9, %v1947_v1 }
 0x455   :  { %v309_v15 = vpop.permute.xlu1 %308 }
 0x456   :  { %v316_v16 = vadd.f32 %v309_v15, %v300_v10  ;;  %v317_v17 = vadd.f32 %v309_v15, %v301_v11 }
 0x458   :  { %v320_v20 = vmul.f32 0.5, %v316_v16  ;;  %v321_v25 = vmul.f32 0.5, %v317_v17 }
 0x459   :  { %v314_v26 = vpop.permute.xlu1 %313 }
 0x45a   :  { %1784 = vtanh.f32 %v320_v20  ;;  %v318_v27 = vadd.f32 %v314_v26, %v302_v18  ;;  %v319_v28 = vadd.f32 %v314_v26, %v303_v19 }
 0x45b   :  { %1786 = vtanh.f32 %v321_v25 }
 0x45c   :  { %v322_v29 = vmul.f32 0.5, %v318_v27  ;;  %v323_v30 = vmul.f32 0.5, %v319_v28 }
 0x45e   :  { %1788 = vtanh.f32 %v322_v29 }
 0x45f   :  { %1790 = vtanh.f32 %v323_v30 }
 0x464   :  { %v1785_v31 = vpop.eup %1784 }
 0x465   :  { %v1787_v32 = vpop.eup %1786  ;;  %v328_v33 = vmul.f32 0.5, %v1785_v31 }
 0x466   :  { %v329_v37 = vmul.f32 0.5, %v1787_v32 }
 0x467   :  { %v332_v38 = vadd.f32 0.5, %v328_v33 }
 0x468   :  { %v1789_v39 = vpop.eup %1788  ;;  %v333_v40 = vadd.f32 0.5, %v329_v37 }
 0x469   :  { %v1791_v42 = vpop.eup %1790  ;;  %v330_v43 = vmul.f32 0.5, %v1789_v39  ;;  %v340_v44 = vmul.f32 %v332_v38, %v1945_v0  ;;  %vm336_vm5 = vcmp.gt.f32.partialorder %v332_v38, 0.5 }
 0x46a   :  { %v331_v45 = vmul.f32 0.5, %v1791_v42  ;;  %v341_v46 = vmul.f32 %v333_v40, %v1947_v1  ;;  %vm337_vm6 = vcmp.gt.f32.partialorder %v333_v40, 0.5  ;;  %v2111_v40 = vld [vmem:[%s2751_s4] sm:$0xff]  }
 0x46b   :  { %v334_v47 = vadd.f32 0.5, %v330_v43  ;;  %v344_v53 = vsel %vm336_vm5, %v1945_v0, %v340_v44  ;;  %v348_v54 = vsel %vm336_vm5, 0.0, %v340_v44 }
 0x46c   :  { %v335_v50 = vadd.f32 0.5, %v331_v45  ;;  %v345_v55 = vsel %vm337_vm6, %v1947_v1, %v341_v46  ;;  %v349_v58 = vsel %vm337_vm6, 0.0, %v341_v46  ;;  %v2072_v1 = vld [vmem:[%s2753_s6] sm:$0xff]  }
 0x46d   :  { %v342_v51 = vmul.f32 %v334_v47, %v1949_v2  ;;  %vm338_vm7 = vcmp.gt.f32.partialorder %v334_v47, 0.5 }
 0x46e   :  { %vm339_vm8 = vcmp.gt.f32.partialorder %v335_v50, 0.5  ;;  %v343_v52 = vmul.f32 %v335_v50, %v1957_v6 }
 0x46f   :  { %v350_v59 = vsel %vm338_vm7, 0.0, %v342_v51  ;;  %v346_v60 = vsel %vm338_vm7, %v1949_v2, %v342_v51 }
 0x470   :  { %v351_v63 = vsel %vm339_vm8, 0.0, %v343_v52  ;;  %v347_v3 = vsel %vm339_vm8, %v1957_v6, %v343_v52  ;;  %v352_v4 = vadd.f32 %v350_v59, %v344_v53  ;;  %v354_v5 = vadd.f32 %v348_v54, %v346_v60 }
 0x471   :  { %v353_v7 = vadd.f32 %v351_v63, %v345_v55  ;;  %v355_v9 = vadd.f32 %v349_v58, %v347_v3 }
 0x472   :  { %v356_v10 = vpack.c.bf16 %v352_v4, %v352_v4  ;;  %v769_v11 = vpack.c.bf16 %v354_v5, %v354_v5  ;;  %v2156_v4 = vld [vmem:[%s2750_s3 + $0x8] sm:$0xff] }
 0x473   :  { %v357_v14 = vpack.c.bf16 %v353_v7, %v353_v7  ;;  %v770_v15 = vpack.c.bf16 %v355_v9, %v355_v9 }
 0x474   :  { %v376_v0 = vsel %vm175_vm4, %v356_v10, 0  ;;  %v780_v16 = vsel %vm175_vm4, %v769_v11, 0 }
 0x475   :  { %1658 = vmatprep.subr.msk.bf16.mxu1 %vm175_vm4, %v357_v14  ;;  %1667 = vmatprep.subr.msk.bf16.mxu0 %vm175_vm4, %v770_v15 }
 0x476   :  { %382 = vmatpush1.bf16.msra.mxu1 %v376_v0  ;;  %786 = vmatpush1.bf16.msra.mxu0 %v780_v16  ;;  %v2195_v16 = vld [vmem:[%s2751_s4 + $0x8] sm:$0xff]  }
 0x477   :  { %1718 = vmatprep.subr.bf16.mxu0 %v1875_v12 }
 0x479   :  { %1668 = vmatmul.mubr.msk.bf16.vlgmr.msra.gmra.mrb[0].mxu0 %vm368_vm9, %v2072_v1  ;;  %1659 = vmatmul.mubr.msk.bf16.vlgmr.msra.gmra.mrb[4].mxu1 %vm368_vm9, %v2111_v40 }
 0x47a   :  { %1707 = vmatprep.mubr.msk.f32.mxu0 %vm1876_vm0, %v1877_v13  ;;  %423 = vmatprep.mubr.bf16.mxu1 %v1882_v8 }
 0x47d   :  { %v930_v2 = vpop.xlane.xlu0 %929 }
 0x481   :  { %v940_v6 = vpop.xlane.xlu0 %939  ;;  %1660 = vmatmul.mubr.msk.bf16.gmra.mrb[8].mxu1 %vm368_vm9, %v2195_v16 }
 0x482   :  { %v944_v19 = vsel %vm77_vm1, %v930_v2, %v940_v6  ;;  %v2205_v2 = vld [vmem:[%s2752_s5 + $0x4] ss:$8 sps:$4 sm:$0xff]  }
 0x483   :  { %1665 = vmatprep.mubr.msk.bf16.mxu1 %vm80_vm2, %v2205_v2 }
 0x485   :  { %v943_v17 = vpop.xlane.xlu0 %942 }
 0x48b   :  { %v933_v18 = vpop.xlane.xlu1 %932 }
 0x48c   :  { %v945_v20 = vsel %vm77_vm1, %v933_v18, %v943_v17 }
 0x48d   :  { %v1719_v25 = vpack.c.bf16 %v945_v20, %v944_v19 }
 0x48f   :  { %1720 = vmatpush3.bf16.msra.mxu0 %v1719_v25 }
 0x492   :  { %1708 = vmatmul.mubr.msk.f32.vlgmr.msra.gmra.mrb[4].mxu0 %vm80_vm2, %v1973_v21 }
 0x493   :  { %1712 = vmatprep.mubr.msk.f32.mxu0 %vm170_vm3, %v1991_v24 }
 0x54c   :  { %v2085_v12 = vpop.f32.mrb[0].mxu0 }
 0x54d   :  { %v2087_v26 = vpop.f32.mrb[1].mxu0 }
 0x54e   :  { %v2091_v13 = vadd.f32 %v2087_v26, %v2085_v12  ;;  %v2093_v27 = vpop.f32.mrb[2].mxu0 }
 0x54f   :  { %v2095_v28 = vpop.f32.mrb[3].mxu0 }
 0x550   :  { %v2099_v29 = vadd.f32 %v2095_v28, %v2093_v27 }
 0x565   :  { %v1012_v21 = vpop.f32.mrb[4].mxu0 }
 0x566   :  { %v1016_v30 = vmul.f32 0.0009765625, %v1012_v21  ;;  %v1709_v31 = vpop.f32.mrb[5].mxu0 }
 0x568   :  { %v1017_v24 = vmul.f32 %v1016_v30, %v1016_v30 }
 0x56a   :  { %1019 = vrot.lane.b32.xlu0 %v1017_v24, %s1879_s1 }
 0x5dc   :  { %v1020_v32 = vpop.permute.xlu0 %1019 }
 0x5dd   :  { %v1022_v33 = vsub.f32 %v1016_v30, %v1020_v32 }
 0x5df   :  { %v1023_v37 = vadd.f32 1e-05, %v1022_v33 }
 0x5e1   :  { %1792 = vrsqrt.f32 %v1023_v37 }
 0x5eb   :  { %v1793_v38 = vpop.eup %1792 }
 0x5ec   :  { %v1025_v39 = vsel %vm77_vm1, %v1016_v30, %v1793_v38 }
 0x5ed   :  { %1710 = vmatprep.subr.msk.mxu0 %vm175_vm4, %v1025_v39 }
 0x5ee   :  { %1711 = vmatpush3.msk.msra.mxu0 %vm175_vm4, %v1025_v39 }
 0x5ef   :  { %1713 = vmatmul.mubr.msk.f32.vlgmr.msra.gmra.mrb[6].mxu0 %vm170_vm3, %v1999_v34 }
 0x5f0   :  { %1234 = vmatprep.mubr.bf16.mxu0 %v1882_v8 }
 0x6c2   :  { %v1714_v42 = vpop.f32.mrb[6].mxu0 }
 0x6c3   :  { %v1095_v43 = vpop.f32.mrb[7].mxu0  ;;  %v1105_v34 = vmul.f32 %v1714_v42, %v2005_v35 }
 0x6c4   :  { %v1104_v44 = vmul.f32 %v1095_v43, %v2007_v36  ;;  %v415_v36 = vpop.f32.mrb[4].mxu1 }
 0x6c5   :  { %v1127_v52 = vmul.f32 %v1105_v34, %v2021_v48  ;;  %v417_v53 = vpop.f32.mrb[5].mxu1 }
 0x6c6   :  { %1108 = vrot.lane.b32.xlu1 %v1104_v44, %s1880_s21  ;;  %v1126_v50 = vmul.f32 %v1104_v44, %v2023_v49  ;;  %v419_v54 = vpop.f32.mrb[6].mxu1 }
 0x6c7   :  { %v421_v35 = vpop.f32.mrb[7].mxu1 }
 0x6ca   :  { %1110 = vrot.lane.b32.xlu1 %v1105_v34, %s1880_s21 }
 0x738   :  { %v1109_v45 = vpop.permute.xlu1 %1108 }
 0x739   :  { %v1114_v46 = vmul.f32 %v1109_v45, %v1095_v43 }
 0x73b   :  { %1118 = vrot.lane.b32.xlu1 %v1114_v46, %s1879_s1 }
 0x73c   :  { %v1111_v47 = vpop.permute.xlu1 %1110 }
 0x73d   :  { %v1115_v51 = vmul.f32 %v1714_v42, %v1111_v47 }
 0x73f   :  { %1120 = vrot.lane.b32.xlu0 %v1115_v51, %s1879_s1  ;;  %1130 = vperm.xlu1 %1771, %v1126_v50  }
 0x743   :  { %1135 = vperm.xlu0 %1772, %v1127_v52  }
 0x7ad   :  { %v1119_v55 = vpop.permute.xlu1 %1118 }
 0x7ae   :  { %v1124_v58 = vsub.f32 %v1980_v22, %v1119_v55  ;;  %v442_v22 = vlaneseq }
 0x7b0   :  { %v1142_v59 = vmul.f32 %v1124_v58, %v2023_v49  ;;  %v2151_v49 = vld [vmem:[%s2750_s3] sm:$0xff]  ;;  %v2211_v30 = vand.u32 127, %v442_v22 }
 0x7b1   :  { %v1121_v60 = vpop.permute.xlu0 %1120 }
 0x7b2   :  { %v1125_v63 = vsub.f32 %v1986_v23, %v1121_v60  ;;  %1146 = vperm.xlu1 %1771, %v1142_v59   ;;  %v2143_v23 = vshrl.u32 %v442_v22, 7  ;;  %vm444_vm10 = vcmp.lt.s32.totalorder %v2211_v30, 17  ;;  %vm473_vm11 = vcmp.lt.s32.totalorder %v2211_v30, 16 }
 0x7b3   :  { %vm502_vm12 = vcmp.lt.s32.totalorder %v2211_v30, 15  ;;  %vm531_vm3 = vcmp.lt.s32.totalorder %v2211_v30, 1  ;;  %vm576_vm5 = vcmp.lt.s32.totalorder %v2211_v30, 127  ;;  %vm605_vm6 = vcmp.lt.s32.totalorder %v2211_v30, 113 }
 0x7b4   :  { %v1143_v3 = vmul.f32 %v1125_v63, %v2021_v48  ;;  %v554_v48 = vsub.s32 4, %v2143_v23  ;;  %v451_v39 = vsub.s32 0, %v2143_v23  ;;  %v480_v55 = vsub.s32 1, %v2143_v23 }
 0x7b5   :  { %v509_v22 = vsub.s32 2, %v2143_v23  ;;  %vm663_vm7 = vcmp.lt.s32.totalorder %v2211_v30, 111 }
 0x7b6   :  { %1151 = vperm.xlu0 %1772, %v1143_v3   ;;  %434 = vrot.lane.b32.xlu1 %v415_v36, %s1883_s25  ;;  %v2159_v5 = vrot.slane %v2156_v4, %v554_v48  ;;  %v2162_v7 = vrot.slane %v2151_v49, %v554_v48  ;;  %v2218_v46 = vrot.slane %v2151_v49, %v451_v39 }
 0x7b7   :  { %v2221_v47 = vrot.slane %v2156_v4, %v451_v39 }
 0x7b8   :  { %v2167_v9 = vmul.f32 %v2159_v5, %v417_v53  ;;  %v2170_v10 = vmul.f32 %v2159_v5, %v421_v35  ;;  %v2173_v11 = vmul.f32 %v2162_v7, %v415_v36  ;;  %v2176_v14 = vmul.f32 %v2162_v7, %v419_v54 }
 0x7ba   :  { %436 = vrot.lane.b32.xlu0 %v419_v54, %s1883_s25  ;;  %438 = vrot.lane.b32.xlu1 %v417_v53, %s1883_s25  ;;  %v565_v15 = vpack.c.bf16 %v2170_v10, %v2167_v9  ;;  %v564_v0 = vpack.c.bf16 %v2176_v14, %v2173_v11 }
 0x7be   :  { %440 = vrot.lane.b32.xlu0 %v421_v35, %s1883_s25  ;;  %465 = vrot.lane.b32.xlu1 %v415_v36, %s1874_s12  ;;  %v1131_v6 = vpop.permute.xlu1 %1130 }
 0x7bf   :  { %v1138_v17 = vmul.f32 %v1131_v6, %v2031_v56  ;;  %v1139_v18 = vmul.f32 %v1131_v6, %v2033_v57 }
 0x7c2   :  { %467 = vrot.lane.b32.xlu0 %v419_v54, %s1874_s12  ;;  %469 = vrot.lane.b32.xlu1 %v417_v53, %s1874_s12  ;;  %v1136_v19 = vpop.permute.xlu0 %1135 }
 0x7c3   :  { %v1140_v31 = vmul.f32 %v1136_v19, %v2041_v61  ;;  %v1141_v24 = vmul.f32 %v1136_v19, %v2043_v62  ;;  %v2239_v19 = vrot.slane %v2156_v4, %v480_v55 }
 0x7c6   :  { %471 = vrot.lane.b32.xlu0 %v421_v35, %s1874_s12  ;;  %494 = vrot.lane.b32.xlu1 %v415_v36, %s1884_s26 }
 0x7ca   :  { %496 = vrot.lane.b32.xlu0 %v419_v54, %s1884_s26  ;;  %498 = vrot.lane.b32.xlu1 %v417_v53, %s1884_s26 }
 0x7ce   :  { %500 = vrot.lane.b32.xlu0 %v421_v35, %s1884_s26  ;;  %523 = vrot.lane.b32.xlu1 %v415_v36, %s1879_s1 }
 0x7d2   :  { %525 = vrot.lane.b32.xlu0 %v419_v54, %s1879_s1  ;;  %527 = vrot.lane.b32.xlu1 %v417_v53, %s1879_s1 }
 0x7d6   :  { %529 = vrot.lane.b32.xlu0 %v421_v35, %s1879_s1  ;;  %568 = vrot.lane.b32.xlu1 %v415_v36, %s1880_s21 }
 0x7da   :  { %570 = vrot.lane.b32.xlu0 %v419_v54, %s1880_s21  ;;  %572 = vrot.lane.b32.xlu1 %v417_v53, %s1880_s21 }
 0x7de   :  { %574 = vrot.lane.b32.xlu0 %v421_v35, %s1880_s21  ;;  %597 = vrot.lane.b32.xlu1 %v415_v36, %s1885_s8 }
 0x7e2   :  { %599 = vrot.lane.b32.xlu0 %v419_v54, %s1885_s8  ;;  %601 = vrot.lane.b32.xlu1 %v417_v53, %s1885_s8 }
 0x7e6   :  { %603 = vrot.lane.b32.xlu0 %v421_v35, %s1885_s8  ;;  %626 = vrot.lane.b32.xlu1 %v415_v36, %s1886_s9 }
 0x7ea   :  { %628 = vrot.lane.b32.xlu0 %v419_v54, %s1886_s9  ;;  %630 = vrot.lane.b32.xlu1 %v417_v53, %s1886_s9 }
 0x7ee   :  { %632 = vrot.lane.b32.xlu0 %v421_v35, %s1886_s9  ;;  %655 = vrot.lane.b32.xlu1 %v415_v36, %s1887_s10 }
 0x7f2   :  { %657 = vrot.lane.b32.xlu0 %v419_v54, %s1887_s10  ;;  %659 = vrot.lane.b32.xlu1 %v417_v53, %s1887_s10 }
 0x7f6   :  { %661 = vrot.lane.b32.xlu0 %v421_v35, %s1887_s10 }
 0x831   :  { %v1147_v20 = vpop.permute.xlu1 %1146 }
 0x832   :  { %v1154_v25 = vadd.f32 %v1147_v20, %v1138_v17  ;;  %v1155_v21 = vadd.f32 %v1147_v20, %v1139_v18 }
 0x834   :  { %v1158_v32 = vmul.f32 0.5, %v1154_v25  ;;  %v1159_v33 = vmul.f32 0.5, %v1155_v21 }
 0x835   :  { %v1152_v37 = vpop.permute.xlu0 %1151  ;;  %v435_v38 = vpop.permute.xlu1 %434 }
 0x836   :  { %1794 = vtanh.f32 %v1158_v32  ;;  %v1156_v42 = vadd.f32 %v1152_v37, %v1140_v31  ;;  %v1157_v43 = vadd.f32 %v1152_v37, %v1141_v24  ;;  %v2242_v31 = vrot.slane %v2151_v49, %v480_v55 }
 0x837   :  { %1796 = vtanh.f32 %v1159_v33 }
 0x838   :  { %v1160_v44 = vmul.f32 0.5, %v1156_v42  ;;  %v1161_v34 = vmul.f32 0.5, %v1157_v43 }
 0x839   :  { %v437_v45 = vpop.permute.xlu0 %436  ;;  %v439_v50 = vpop.permute.xlu1 %438 }
 0x83a   :  { %1798 = vtanh.f32 %v1160_v44  ;;  %v445_v51 = vsel %vm444_vm10, %v435_v38, %v439_v50  ;;  %v447_v52 = vsel %vm444_vm10, %v439_v50, %v435_v38 }
 0x83b   :  { %1800 = vtanh.f32 %v1161_v34  ;;  %v457_v53 = vmul.f32 %v2218_v46, %v447_v52  ;;  %v458_v54 = vmul.f32 %v2221_v47, %v445_v51 }
 0x83d   :  { %v441_v36 = vpop.permute.xlu0 %440  ;;  %v466_v35 = vpop.permute.xlu1 %465 }
 0x83e   :  { %v446_v58 = vsel %vm444_vm10, %v437_v45, %v441_v36  ;;  %v448_v59 = vsel %vm444_vm10, %v441_v36, %v437_v45  ;;  %v2255_v45 = vrot.slane %v2151_v49, %v509_v22  ;;  %v2261_v36 = vrot.slane %v2156_v4, %v509_v22 }
 0x83f   :  { %v459_v60 = vmul.f32 %v2218_v46, %v448_v59  ;;  %v460_v63 = vmul.f32 %v2221_v47, %v446_v58 }
 0x840   :  { %v1795_v3 = vpop.eup %1794 }
 0x841   :  { %v1797_v48 = vpop.eup %1796  ;;  %v1166_v6 = vmul.f32 0.5, %v1795_v3  ;;  %v461_v17 = vpack.c.bf16 %v459_v60, %v457_v53  ;;  %v468_v18 = vpop.permute.xlu0 %467  ;;  %v462_v25 = vpack.c.bf16 %v460_v63, %v458_v54 }
 0x842   :  { %v470_v20 = vpop.permute.xlu1 %469  ;;  %v1167_v21 = vmul.f32 0.5, %v1797_v48 }
 0x843   :  { %v474_v24 = vsel %vm473_vm11, %v466_v35, %v470_v20  ;;  %v2246_v32 = vadd.f32 0.5, %v1166_v6  ;;  %v476_v33 = vsel %vm473_vm11, %v470_v20, %v466_v35  ;;  %722 = vmatprep.subr.bf16.mxu1 %v462_v25 }
 0x844   :  { %v1799_v37 = vpop.eup %1798  ;;  %v2250_v38 = vadd.f32 0.5, %v1167_v21  ;;  %723 = vmatpush1.bf16.msra.mxu1 %v461_v17  ;;  %v487_v44 = vmul.f32 %v2239_v19, %v474_v24  ;;  %v486_v52 = vmul.f32 %v2242_v31, %v476_v33 }
 0x845   :  { %v1801_v39 = vpop.eup %1800  ;;  %v1168_v42 = vmul.f32 0.5, %v1799_v37  ;;  %v472_v43 = vpop.permute.xlu0 %471  ;;  %v2265_v53 = vmul.f32 %v2246_v32, %v2031_v56  ;;  %vm1174_vm13 = vcmp.gt.f32.partialorder %v2246_v32, 0.5 }
 0x846   :  { %v495_v34 = vpop.permute.xlu1 %494  ;;  %v1169_v50 = vmul.f32 0.5, %v1801_v39  ;;  %v475_v51 = vsel %vm473_vm11, %v468_v18, %v472_v43  ;;  %v477_v35 = vsel %vm473_vm11, %v472_v43, %v468_v18  ;;  %v2275_v58 = vmul.f32 %v2250_v38, %v2033_v57 }
 0x847   :  { %v2267_v54 = vadd.f32 0.5, %v1168_v42  ;;  %v489_v55 = vmul.f32 %v2239_v19, %v475_v51  ;;  %v488_v60 = vmul.f32 %v2242_v31, %v477_v35  ;;  %vm1175_vm14 = vcmp.gt.f32.partialorder %v2250_v38, 0.5 }
 0x848   :  { %v2277_v59 = vadd.f32 0.5, %v1169_v50  ;;  %v1182_v25 = vsel %vm1174_vm13, %v2031_v56, %v2265_v53  ;;  %v1183_v24 = vsel %vm1175_vm14, %v2033_v57, %v2275_v58 }
 0x849   :  { %v2283_v63 = vmul.f32 %v2267_v54, %v2041_v61  ;;  %v497_v3 = vpop.permute.xlu0 %496  ;;  %vm1176_vm15 = vcmp.gt.f32.partialorder %v2267_v54, 0.5  ;;  %v491_v48 = vpack.c.bf16 %v489_v55, %v487_v44  ;;  %v490_v17 = vpack.c.bf16 %v488_v60, %v486_v52 }
 0x84a   :  { %v499_v22 = vpop.permute.xlu1 %498  ;;  %vm1177_vm0 = vcmp.gt.f32.partialorder %v2277_v59, 0.5  ;;  %v2289_v6 = vmul.f32 %v2277_v59, %v2043_v62  ;;  %v1186_v54 = vsel %vm1174_vm13, 0.0, %v2265_v53  ;;  %v1888_v53 = vmov 3  }
 0x84b   :  { %v503_v18 = vsel %vm502_vm12, %v495_v34, %v499_v22  ;;  %v505_v20 = vsel %vm502_vm12, %v499_v22, %v495_v34  ;;  %v1188_v21 = vsel %vm1176_vm15, 0.0, %v2283_v63  ;;  %724 = vmatprep.subr.bf16.mxu1 %v491_v48  ;;  %v538_v34 = vsub.s32 3, %v2143_v23  ;;  %1773 = vset.pattern.permute.xlu1 %v1888_v53 }
 0x84c   :  { %v1189_v33 = vsel %vm1177_vm0, 0.0, %v2289_v6  ;;  %v1190_v37 = vadd.f32 %v1188_v21, %v1182_v25  ;;  %725 = vmatpush1.bf16.msra.mxu1 %v490_v17  ;;  %v515_v42 = vmul.f32 %v2255_v45, %v505_v20  ;;  %v516_v56 = vmul.f32 %v2261_v36, %v503_v18  ;;  %1774 = vset.pattern.permute.xlu0 %v1888_v53 }
 0x84d   :  { %v501_v39 = vpop.permute.xlu0 %500  ;;  %v1191_v43 = vadd.f32 %v1189_v33, %v1183_v24  ;;  %v2322_v17 = vrot.slane %v2151_v49, %v538_v34  ;;  %v2325_v18 = vrot.slane %v2156_v4, %v538_v34 }
 0x84e   :  { %v524_v44 = vpop.permute.xlu1 %523  ;;  %v504_v50 = vsel %vm502_vm12, %v497_v3, %v501_v39  ;;  %v506_v57 = vsel %vm502_vm12, %v501_v39, %v497_v3  ;;  %v1194_v51 = vpack.c.bf16 %v1190_v37, %v1190_v37 }
 0x84f   :  { %v517_v52 = vmul.f32 %v2255_v45, %v506_v57  ;;  %v518_v35 = vmul.f32 %v2261_v36, %v504_v50  ;;  %v1195_v55 = vpack.c.bf16 %v1191_v43, %v1191_v43 }
 0x850   :  { %v1197_v60 = vsel %vm175_vm4, %v1194_v51, 0 }
 0x851   :  { %v519_v22 = vpack.c.bf16 %v517_v52, %v515_v42  ;;  %1673 = vmatprep.subr.msk.bf16.mxu0 %vm175_vm4, %v1195_v55  ;;  %v526_v48 = vpop.permute.xlu0 %525  ;;  %v520_v20 = vpack.c.bf16 %v518_v35, %v516_v56  ;;  %v583_v42 = vsub.s32 5, %v2143_v23 }
 0x852   :  { %v528_v3 = vpop.permute.xlu1 %527  ;;  %1203 = vmatpush1.bf16.msra.mxu0 %v1197_v60 }
 0x853   :  { %v532_v25 = vsel %vm531_vm3, %v524_v44, %v528_v3  ;;  %v534_v21 = vsel %vm531_vm3, %v528_v3, %v524_v44  ;;  %726 = vmatprep.subr.bf16.mxu1 %v520_v20  ;;  %v2345_v57 = vrot.slane %v2151_v49, %v583_v42  ;;  %v2348_v51 = vrot.slane %v2156_v4, %v583_v42 }
 0x854   :  { %727 = vmatpush1.bf16.msra.mxu1 %v519_v22  ;;  %v544_v33 = vmul.f32 %v2322_v17, %v534_v21  ;;  %v545_v37 = vmul.f32 %v2325_v18, %v532_v25  ;;  %v612_v25 = vsub.s32 6, %v2143_v23 }
 0x855   :  { %1674 = vmatmul.mubr.msk.bf16.vlgmr.msra.gmra.mrb[8].mxu0 %vm368_vm9, %v2111_v40  ;;  %v530_v24 = vpop.permute.xlu0 %529 }
 0x856   :  { %v569_v39 = vpop.permute.xlu1 %568  ;;  %v533_v56 = vsel %vm531_vm3, %v526_v48, %v530_v24  ;;  %v535_v43 = vsel %vm531_vm3, %v530_v24, %v526_v48  ;;  %1244 = vmatprep.mubr.bf16.mxu0 %v1882_v8 }
 0x857   :  { %v546_v44 = vmul.f32 %v2322_v17, %v535_v43  ;;  %v547_v40 = vmul.f32 %v2325_v18, %v533_v56 }
 0x859   :  { %v548_v34 = vpack.c.bf16 %v546_v44, %v544_v33  ;;  %v571_v50 = vpop.permute.xlu0 %570  ;;  %v549_v52 = vpack.c.bf16 %v547_v40, %v545_v37  ;;  %v2378_v37 = vrot.slane %v2156_v4, %v612_v25  ;;  %v641_v44 = vsub.s32 7, %v2143_v23 }
 0x85a   :  { %v573_v35 = vpop.permute.xlu1 %572 }
 0x85b   :  { %v577_v55 = vsel %vm576_vm5, %v569_v39, %v573_v35  ;;  %v579_v60 = vsel %vm576_vm5, %v573_v35, %v569_v39  ;;  %728 = vmatprep.subr.bf16.mxu1 %v549_v52 }
 0x85c   :  { %729 = vmatpush1.bf16.msra.mxu1 %v548_v34  ;;  %v589_v48 = vmul.f32 %v2345_v57, %v577_v55  ;;  %v590_v3 = vmul.f32 %v2348_v51, %v579_v60  ;;  %v2395_v60 = vrot.slane %v2151_v49, %v641_v44 }
 0x85d   :  { %v575_v22 = vpop.permute.xlu0 %574  ;;  %730 = vmatprep.subr.bf16.mxu1 %v565_v15  ;;  %1675 = vmatmul.mubr.msk.bf16.gmra.mrb[12].mxu0 %vm368_vm9, %v2195_v16  ;;  %v2375_v16 = vrot.slane %v2151_v49, %v612_v25 }
 0x85e   :  { %v598_v20 = vpop.permute.xlu1 %597  ;;  %v578_v21 = vsel %vm576_vm5, %v571_v50, %v575_v22  ;;  %v580_v24 = vsel %vm576_vm5, %v575_v22, %v571_v50  ;;  %1676 = vmatprep.mubr.msk.bf16.mxu0 %vm80_vm2, %v2205_v2  ;;  %vm634_vm2 = vcmp.lt.s32.totalorder %v2211_v30, 112  ;;  %v2398_v22 = vrot.slane %v2156_v4, %v641_v44 }
 0x85f   :  { %v591_v33 = vmul.f32 %v2345_v57, %v578_v21  ;;  %v592_v9 = vmul.f32 %v2348_v51, %v580_v24  ;;  %v1184_v44 = vsel %vm1176_vm15, %v2041_v61, %v2283_v63 }
 0x860   :  { %731 = vmatpush1.bf16.msra.mxu1 %v564_v0 }
 0x861   :  { %v593_v10 = vpack.c.bf16 %v591_v33, %v589_v48  ;;  %v600_v15 = vpop.permute.xlu0 %599  ;;  %v594_v2 = vpack.c.bf16 %v592_v9, %v590_v3 }
 0x862   :  { %v602_v39 = vpop.permute.xlu1 %601 }
 0x863   :  { %v606_v42 = vsel %vm605_vm6, %v598_v20, %v602_v39  ;;  %v608_v56 = vsel %vm605_vm6, %v602_v39, %v598_v20  ;;  %732 = vmatprep.subr.bf16.mxu1 %v594_v2 }
 0x864   :  { %733 = vmatpush1.bf16.msra.mxu1 %v593_v10  ;;  %v618_v14 = vmul.f32 %v2375_v16, %v606_v42  ;;  %v619_v0 = vmul.f32 %v2378_v37, %v608_v56  ;;  %v2416_v56 = vld [vmem:[%s2750_s3 + $0x10] ss:$0 sm:$0xff] }
 0x865   :  { %v604_v11 = vpop.permute.xlu0 %603 }
 0x866   :  { %v627_v43 = vpop.permute.xlu1 %626  ;;  %v607_v40 = vsel %vm605_vm6, %v600_v15, %v604_v11  ;;  %v609_v34 = vsel %vm605_vm6, %v604_v11, %v600_v15  ;;  %v2421_v11 = vld [vmem:[%s2750_s3 + $0x18] ss:$0 sm:$0xff] }
 0x867   :  { %v620_v50 = vmul.f32 %v2375_v16, %v607_v40  ;;  %v621_v52 = vmul.f32 %v2378_v37, %v609_v34 }
 0x869   :  { %v622_v35 = vpack.c.bf16 %v620_v50, %v618_v14  ;;  %v629_v55 = vpop.permute.xlu0 %628  ;;  %v623_v48 = vpack.c.bf16 %v621_v52, %v619_v0 }
 0x86a   :  { %v631_v23 = vpop.permute.xlu1 %630 }
 0x86b   :  { %v635_v3 = vsel %vm634_vm2, %v627_v43, %v631_v23  ;;  %v637_v20 = vsel %vm634_vm2, %v631_v23, %v627_v43  ;;  %734 = vmatprep.subr.bf16.mxu1 %v623_v48  ;;  %v1185_v43 = vsel %vm1177_vm0, %v2043_v62, %v2289_v6  ;;  %v1187_v62 = vsel %vm1175_vm14, 0.0, %v2275_v58 }
 0x86c   :  { %735 = vmatpush1.bf16.msra.mxu1 %v622_v35  ;;  %v647_v21 = vmul.f32 %v2395_v60, %v635_v3  ;;  %v648_v24 = vmul.f32 %v2398_v22, %v637_v20  ;;  %v1193_v63 = vadd.f32 %v1187_v62, %v1185_v43  ;;  %v1192_v6 = vadd.f32 %v1186_v54, %v1184_v44  ;;  %v2452_v3 = vld [vmem:[%s2752_s5] ss:$8 sps:$4 sm:$0xff]  }
 0x86d   :  { %v633_v25 = vpop.permute.xlu0 %632 }
 0x86e   :  { %v656_v49 = vpop.permute.xlu1 %655  ;;  %v636_v4 = vsel %vm634_vm2, %v629_v55, %v633_v25  ;;  %v638_v33 = vsel %vm634_vm2, %v633_v25, %v629_v55  ;;  %v1489_v48 = vpack.c.bf16 %v1193_v63, %v1193_v63  ;;  %v1488_v38 = vpack.c.bf16 %v1192_v6, %v1192_v6 }
 0x86f   :  { %v649_v9 = vmul.f32 %v2395_v60, %v636_v4  ;;  %v650_v10 = vmul.f32 %v2398_v22, %v638_v33 }
 0x870   :  { %v1491_v32 = vsel %vm175_vm4, %v1488_v38, 0 }
 0x871   :  { %v651_v15 = vpack.c.bf16 %v649_v9, %v647_v21  ;;  %v658_v39 = vpop.permute.xlu0 %657  ;;  %v652_v42 = vpack.c.bf16 %v650_v10, %v648_v24 }
 0x872   :  { %v660_v2 = vpop.permute.xlu1 %659 }
 0x873   :  { %v664_v14 = vsel %vm663_vm7, %v656_v49, %v660_v2  ;;  %v666_v0 = vsel %vm663_vm7, %v660_v2, %v656_v49  ;;  %736 = vmatprep.subr.bf16.mxu1 %v652_v42 }
 0x874   :  { %737 = vmatpush1.bf16.msra.mxu1 %v651_v15  ;;  %v676_v34 = vmul.f32 %v2416_v56, %v664_v14  ;;  %v677_v50 = vmul.f32 %v2421_v11, %v666_v0  ;;  %v1822_v15 = vld [vmem:[%s2749_s2] sm:$0xff] }
 0x875   :  { %v662_v40 = vpop.permute.xlu0 %661 }
 0x876   :  { %v665_v52 = vsel %vm663_vm7, %v658_v39, %v662_v40  ;;  %v667_v35 = vsel %vm663_vm7, %v662_v40, %v658_v39  ;;  %v1823_v39 = vld [vmem:[%s2749_s2 + $0x8] sm:$0xff] }
 0x877   :  { %v678_v61 = vmul.f32 %v2416_v56, %v665_v52  ;;  %v679_v59 = vmul.f32 %v2421_v11, %v667_v35 }
 0x879   :  { %v680_v55 = vpack.c.bf16 %v678_v61, %v676_v34  ;;  %v681_v23 = vpack.c.bf16 %v679_v59, %v677_v50 }
 0x87b   :  { %738 = vmatprep.subr.bf16.mxu1 %v681_v23 }
 0x87c   :  { %739 = vmatpush1.bf16.msra.mxu1 %v680_v55 }
 0x87d   :  { %1677 = vmatprep.subr.msk.bf16.mxu1 %vm175_vm4, %v1489_v48 }
 0x87f   :  { %755 = vmatmul.mubr.bf16.vlgmr.msra.gmra.mrb[8].mxu1 %v2452_v3 }
 0x880   :  { %1497 = vmatpush1.bf16.msra.mxu1 %v1491_v32  ;;  %1528 = vmatprep.mubr.bf16.mxu1 %v1882_v8 }
 0x887   :  { %1678 = vmatmul.mubr.msk.bf16.vlgmr.msra.gmra.mrb[12].mxu1 %vm368_vm9, %v2072_v1 }
 0x928   :  { %v1236_v58 = vpop.f32.mrb[8].mxu0 }
 0x929   :  { %1255 = vrot.lane.b32.xlu1 %v1236_v58, %s1883_s25  ;;  %v1238_v20 = vpop.f32.mrb[9].mxu0  ;;  %v2463_v24 = vmul.f32 %v1236_v58, %v2162_v7 }
 0x92a   :  { %v1240_v25 = vpop.f32.mrb[10].mxu0  ;;  %v2469_v8 = vmul.f32 %v1238_v20, %v2159_v5 }
 0x92b   :  { %1257 = vrot.lane.b32.xlu0 %v1240_v25, %s1883_s25  ;;  %v1242_v21 = vpop.f32.mrb[11].mxu0  ;;  %v2466_v49 = vmul.f32 %v1240_v25, %v2162_v7 }
 0x92c   :  { %v2472_v1 = vmul.f32 %v1242_v21, %v2159_v5 }
 0x92d   :  { %1275 = vrot.lane.b32.xlu1 %v1236_v58, %s1874_s12  ;;  %v1339_v4 = vpack.c.bf16 %v2466_v49, %v2463_v24 }
 0x92e   :  { %v1340_v33 = vpack.c.bf16 %v2472_v1, %v2469_v8 }
 0x92f   :  { %1277 = vrot.lane.b32.xlu0 %v1240_v25, %s1874_s12 }
 0x931   :  { %1295 = vrot.lane.b32.xlu1 %v1236_v58, %s1884_s26 }
 0x933   :  { %1297 = vrot.lane.b32.xlu0 %v1240_v25, %s1884_s26 }
 0x935   :  { %1315 = vrot.lane.b32.xlu1 %v1236_v58, %s1879_s1 }
 0x937   :  { %1317 = vrot.lane.b32.xlu0 %v1240_v25, %s1879_s1 }
 0x939   :  { %1343 = vrot.lane.b32.xlu1 %v1236_v58, %s1880_s21 }
 0x93b   :  { %1345 = vrot.lane.b32.xlu0 %v1240_v25, %s1880_s21 }
 0x93d   :  { %1363 = vrot.lane.b32.xlu1 %v1236_v58, %s1885_s8 }
 0x93f   :  { %1365 = vrot.lane.b32.xlu0 %v1240_v25, %s1885_s8 }
 0x941   :  { %1383 = vrot.lane.b32.xlu1 %v1236_v58, %s1886_s9 }
 0x943   :  { %1385 = vrot.lane.b32.xlu0 %v1240_v25, %s1886_s9 }
 0x945   :  { %1259 = vrot.lane.b32.xlu1 %v1238_v20, %s1883_s25 }
 0x947   :  { %1261 = vrot.lane.b32.xlu0 %v1242_v21, %s1883_s25 }
 0x949   :  { %1279 = vrot.lane.b32.xlu1 %v1238_v20, %s1874_s12 }
 0x94b   :  { %1281 = vrot.lane.b32.xlu0 %v1242_v21, %s1874_s12 }
 0x94d   :  { %1299 = vrot.lane.b32.xlu1 %v1238_v20, %s1884_s26 }
 0x94f   :  { %1301 = vrot.lane.b32.xlu0 %v1242_v21, %s1884_s26 }
 0x951   :  { %1319 = vrot.lane.b32.xlu1 %v1238_v20, %s1879_s1 }
 0x952   :  { %v2501_v5 = vpop.f32.mrb[8].mxu1 }
 0x953   :  { %1321 = vrot.lane.b32.xlu0 %v1242_v21, %s1879_s1  ;;  %v2503_v7 = vpop.f32.mrb[9].mxu1 }
 0x954   :  { %v2506_v9 = vpop.f32.mrb[10].mxu1 }
 0x955   :  { %1403 = vrot.lane.b32.xlu1 %v1236_v58, %s1887_s10  ;;  %v2508_v10 = vpop.f32.mrb[11].mxu1 }
 0x957   :  { %1405 = vrot.lane.b32.xlu0 %v1240_v25, %s1887_s10 }
 0x959   :  { %1347 = vrot.lane.b32.xlu1 %v1238_v20, %s1880_s21 }
 0x95b   :  { %1349 = vrot.lane.b32.xlu0 %v1242_v21, %s1880_s21 }
 0x95d   :  { %1367 = vrot.lane.b32.xlu1 %v1238_v20, %s1885_s8 }
 0x95f   :  { %1369 = vrot.lane.b32.xlu0 %v1242_v21, %s1885_s8 }
 0x961   :  { %1387 = vrot.lane.b32.xlu1 %v1238_v20, %s1886_s9 }
 0x963   :  { %1389 = vrot.lane.b32.xlu0 %v1242_v21, %s1886_s9 }
 0x965   :  { %1407 = vrot.lane.b32.xlu1 %v1238_v20, %s1887_s10 }
 0x967   :  { %1409 = vrot.lane.b32.xlu0 %v1242_v21, %s1887_s10 }
 0x969   :  { %703 = vperm.xlu1 %1773, %v1822_v15  }
 0x96b   :  { %707 = vperm.xlu0 %1774, %v1823_v39  }
 0x96f   :  { %1775 = vset.pattern.permute.xlu0 %v1881_v41 }
 0x99b   :  { %v1256_v2 = vpop.permute.xlu1 %1255 }
 0x99d   :  { %v1258_v42 = vpop.permute.xlu0 %1257 }
 0x99f   :  { %v1276_v14 = vpop.permute.xlu1 %1275 }
 0x9a1   :  { %v1278_v0 = vpop.permute.xlu0 %1277 }
 0x9a3   :  { %v1296_v43 = vpop.permute.xlu1 %1295 }
 0x9a5   :  { %v1298_v44 = vpop.permute.xlu0 %1297 }
 0x9a7   :  { %v1316_v40 = vpop.permute.xlu1 %1315 }
 0x9a9   :  { %v1318_v34 = vpop.permute.xlu0 %1317 }
 0x9ab   :  { %v2523_v50 = vpop.permute.xlu1 %1343 }
 0x9ad   :  { %v2525_v52 = vpop.permute.xlu0 %1345 }
 0x9af   :  { %v2527_v35 = vpop.permute.xlu1 %1363 }
 0x9b1   :  { %v2529_v62 = vpop.permute.xlu0 %1365 }
 0x9b3   :  { %v2531_v54 = vpop.permute.xlu1 %1383 }
 0x9b5   :  { %v2533_v61 = vpop.permute.xlu0 %1385 }
 0x9b7   :  { %v1260_v41 = vpop.permute.xlu1 %1259 }
 0x9b8   :  { %v1263_v59 = vsel %vm444_vm10, %v1256_v2, %v1260_v41  ;;  %v1265_v63 = vsel %vm444_vm10, %v1260_v41, %v1256_v2 }
 0x9b9   :  { %v1262_v6 = vpop.permute.xlu0 %1261  ;;  %v1267_v48 = vmul.f32 %v1265_v63, %v2218_v46  ;;  %v1268_v38 = vmul.f32 %v1263_v59, %v2221_v47 }
 0x9ba   :  { %v1264_v55 = vsel %vm444_vm10, %v1258_v42, %v1262_v6  ;;  %v1266_v23 = vsel %vm444_vm10, %v1262_v6, %v1258_v42 }
 0x9bb   :  { %v1269_v32 = vmul.f32 %v1266_v23, %v2218_v46  ;;  %v1270_v53 = vmul.f32 %v1264_v55, %v2221_v47  ;;  %v1280_v58 = vpop.permute.xlu1 %1279 }
 0x9bc   :  { %v1283_v20 = vsel %vm473_vm11, %v1276_v14, %v1280_v58  ;;  %v1285_v25 = vsel %vm473_vm11, %v1280_v58, %v1276_v14 }
 0x9bd   :  { %v1271_v21 = vpack.c.bf16 %v1269_v32, %v1267_v48  ;;  %v1282_v15 = vpop.permute.xlu0 %1281  ;;  %v1272_v39 = vpack.c.bf16 %v1270_v53, %v1268_v38  ;;  %v1287_v46 = vmul.f32 %v1285_v25, %v2242_v31  ;;  %v1288_v47 = vmul.f32 %v1283_v20, %v2239_v19 }
 0x9be   :  { %v1284_v2 = vsel %vm473_vm11, %v1278_v0, %v1282_v15  ;;  %v1286_v42 = vsel %vm473_vm11, %v1282_v15, %v1278_v0 }
 0x9bf   :  { %v1289_v41 = vmul.f32 %v1286_v42, %v2242_v31  ;;  %v1290_v59 = vmul.f32 %v1284_v2, %v2239_v19  ;;  %1441 = vmatprep.subr.bf16.mxu0 %v1272_v39  ;;  %v1300_v63 = vpop.permute.xlu1 %1299 }
 0x9c0   :  { %v1303_v14 = vsel %vm502_vm12, %v1296_v43, %v1300_v63  ;;  %v1305_v6 = vsel %vm502_vm12, %v1300_v63, %v1296_v43  ;;  %1442 = vmatpush1.bf16.msra.mxu0 %v1271_v21 }
 0x9c1   :  { %v1291_v55 = vpack.c.bf16 %v1289_v41, %v1287_v46  ;;  %v1302_v23 = vpop.permute.xlu0 %1301  ;;  %v1292_v0 = vpack.c.bf16 %v1290_v59, %v1288_v47  ;;  %v1307_v19 = vmul.f32 %v1305_v6, %v2255_v45  ;;  %v1308_v38 = vmul.f32 %v1303_v14, %v2261_v36 }
 0x9c2   :  { %v1304_v48 = vsel %vm502_vm12, %v1298_v44, %v1302_v23  ;;  %v1306_v31 = vsel %vm502_vm12, %v1302_v23, %v1298_v44 }
 0x9c3   :  { %v1309_v32 = vmul.f32 %v1306_v31, %v2255_v45  ;;  %v1310_v53 = vmul.f32 %v1304_v48, %v2261_v36  ;;  %1443 = vmatprep.subr.bf16.mxu0 %v1292_v0  ;;  %v1320_v43 = vpop.permute.xlu1 %1319 }
 0x9c4   :  { %v1323_v58 = vsel %vm531_vm3, %v1316_v40, %v1320_v43  ;;  %v1325_v20 = vsel %vm531_vm3, %v1320_v43, %v1316_v40  ;;  %1444 = vmatpush1.bf16.msra.mxu0 %v1291_v55 }
 0x9c5   :  { %v1311_v25 = vpack.c.bf16 %v1309_v32, %v1307_v19  ;;  %v1322_v21 = vpop.permute.xlu0 %1321  ;;  %v1312_v44 = vpack.c.bf16 %v1310_v53, %v1308_v38  ;;  %v1327_v36 = vmul.f32 %v1325_v20, %v2322_v17  ;;  %v1328_v39 = vmul.f32 %v1323_v58, %v2325_v18 }
 0x9c6   :  { %v1324_v15 = vsel %vm531_vm3, %v1318_v34, %v1322_v21  ;;  %v1326_v45 = vsel %vm531_vm3, %v1322_v21, %v1318_v34 }
 0x9c7   :  { %v1329_v2 = vmul.f32 %v1326_v45, %v2322_v17  ;;  %v1330_v42 = vmul.f32 %v1324_v15, %v2325_v18  ;;  %1445 = vmatprep.subr.bf16.mxu0 %v1312_v44  ;;  %v1404_v40 = vpop.permute.xlu1 %1403 }
 0x9c8   :  { %1446 = vmatpush1.bf16.msra.mxu0 %v1311_v25 }
 0x9c9   :  { %v1331_v46 = vpack.c.bf16 %v1329_v2, %v1327_v36  ;;  %v1406_v47 = vpop.permute.xlu0 %1405  ;;  %v1332_v41 = vpack.c.bf16 %v1330_v42, %v1328_v39 }
 0x9cb   :  { %1447 = vmatprep.subr.bf16.mxu0 %v1332_v41  ;;  %v1348_v59 = vpop.permute.xlu1 %1347 }
 0x9cc   :  { %v1351_v34 = vsel %vm576_vm5, %v2523_v50, %v1348_v59  ;;  %v1353_v63 = vsel %vm576_vm5, %v1348_v59, %v2523_v50  ;;  %1448 = vmatpush1.bf16.msra.mxu0 %v1331_v46 }
 0x9cd   :  { %v1350_v17 = vpop.permute.xlu0 %1349  ;;  %1449 = vmatprep.subr.bf16.mxu0 %v1340_v33  ;;  %v1355_v6 = vmul.f32 %v1351_v34, %v2345_v57  ;;  %v1356_v55 = vmul.f32 %v1353_v63, %v2348_v51 }
 0x9ce   :  { %v1352_v18 = vsel %vm576_vm5, %v2525_v52, %v1350_v17  ;;  %v1354_v14 = vsel %vm576_vm5, %v1350_v17, %v2525_v52 }
 0x9cf   :  { %v1357_v50 = vmul.f32 %v1352_v18, %v2345_v57  ;;  %v1358_v23 = vmul.f32 %v1354_v14, %v2348_v51  ;;  %v1368_v0 = vpop.permute.xlu1 %1367 }
 0x9d0   :  { %v1371_v8 = vsel %vm605_vm6, %v2527_v35, %v1368_v0  ;;  %v1373_v1 = vsel %vm605_vm6, %v1368_v0, %v2527_v35  ;;  %1450 = vmatpush1.bf16.msra.mxu0 %v1339_v4 }
 0x9d1   :  { %v1359_v33 = vpack.c.bf16 %v1357_v50, %v1355_v6  ;;  %v1370_v52 = vpop.permute.xlu0 %1369  ;;  %v1360_v48 = vpack.c.bf16 %v1358_v23, %v1356_v55  ;;  %v1375_v31 = vmul.f32 %v1371_v8, %v2375_v16  ;;  %v1376_v19 = vmul.f32 %v1373_v1, %v2378_v37 }
 0x9d2   :  { %v1372_v57 = vsel %vm605_vm6, %v2529_v62, %v1370_v52  ;;  %v1374_v51 = vsel %vm605_vm6, %v1370_v52, %v2529_v62 }
 0x9d3   :  { %v1377_v35 = vmul.f32 %v1372_v57, %v2375_v16  ;;  %v1378_v24 = vmul.f32 %v1374_v51, %v2378_v37  ;;  %1451 = vmatprep.subr.bf16.mxu0 %v1360_v48  ;;  %v1388_v49 = vpop.permute.xlu1 %1387 }
 0x9d4   :  { %v1391_v4 = vsel %vm634_vm2, %v2531_v54, %v1388_v49  ;;  %v1393_v38 = vsel %vm634_vm2, %v1388_v49, %v2531_v54  ;;  %1452 = vmatpush1.bf16.msra.mxu0 %v1359_v33 }
 0x9d5   :  { %v1379_v62 = vpack.c.bf16 %v1377_v35, %v1375_v31  ;;  %v1390_v32 = vpop.permute.xlu0 %1389  ;;  %v1380_v53 = vpack.c.bf16 %v1378_v24, %v1376_v19  ;;  %v1395_v43 = vmul.f32 %v1391_v4, %v2395_v60  ;;  %v1396_v58 = vmul.f32 %v1393_v38, %v2398_v22 }
 0x9d6   :  { %v1392_v16 = vsel %vm634_vm2, %v2533_v61, %v1390_v32  ;;  %v1394_v37 = vsel %vm634_vm2, %v1390_v32, %v2533_v61 }
 0x9d7   :  { %v1397_v20 = vmul.f32 %v1392_v16, %v2395_v60  ;;  %v1398_v54 = vmul.f32 %v1394_v37, %v2398_v22  ;;  %1453 = vmatprep.subr.bf16.mxu0 %v1380_v53  ;;  %v1408_v25 = vpop.permute.xlu1 %1407 }
 0x9d8   :  { %v1411_v21 = vsel %vm663_vm7, %v1404_v40, %v1408_v25  ;;  %v1413_v44 = vsel %vm663_vm7, %v1408_v25, %v1404_v40  ;;  %1454 = vmatpush1.bf16.msra.mxu0 %v1379_v62 }
 0x9d9   :  { %v1399_v15 = vpack.c.bf16 %v1397_v20, %v1395_v43  ;;  %v1410_v45 = vpop.permute.xlu0 %1409  ;;  %v1400_v61 = vpack.c.bf16 %v1398_v54, %v1396_v58  ;;  %v1415_v22 = vmul.f32 %v2416_v56, %v1411_v21  ;;  %v1416_v39 = vmul.f32 %v2421_v11, %v1413_v44 }
 0x9da   :  { %v1412_v36 = vsel %vm663_vm7, %v1406_v47, %v1410_v45  ;;  %v1414_v60 = vsel %vm663_vm7, %v1410_v45, %v1406_v47 }
 0x9db   :  { %v1417_v2 = vmul.f32 %v2416_v56, %v1412_v36  ;;  %v1418_v42 = vmul.f32 %v2421_v11, %v1414_v60  ;;  %1455 = vmatprep.subr.bf16.mxu0 %v1400_v61 }
 0x9dc   :  { %1456 = vmatpush1.bf16.msra.mxu0 %v1399_v15 }
 0x9dd   :  { %v1419_v40 = vpack.c.bf16 %v1417_v2, %v1415_v22  ;;  %v1420_v46 = vpack.c.bf16 %v1418_v42, %v1416_v39 }
 0x9df   :  { %1457 = vmatprep.subr.bf16.mxu0 %v1420_v46 }
 0x9e0   :  { %1458 = vmatpush1.bf16.msra.mxu0 %v1419_v40 }
 0x9e3   :  { %1474 = vmatmul.mubr.bf16.vlgmr.msra.gmra.mrb[12].mxu0 %v2452_v3 }
 0x9e8   :  { %v704_v41 = vpop.permute.xlu1 %703 }
 0x9e9   :  { %v2651_v30 = vadd.f32 %v2501_v5, %v704_v41  ;;  %v2654_v47 = vadd.f32 %v2503_v7, %v704_v41  ;;  %v2668_v5 = vpop.f32.mrb[12].mxu1 }
 0x9ea   :  { %v708_v59 = vpop.permute.xlu0 %707  ;;  %v2670_v7 = vpop.f32.mrb[13].mxu1 }
 0x9eb   :  { %v828_v56 = vadd.f32 %v2654_v47, %v2651_v30  ;;  %v2659_v11 = vadd.f32 %v2506_v9, %v708_v59  ;;  %v2662_v34 = vadd.f32 %v2508_v10, %v708_v59  ;;  %v1547_v9 = vadd.f32 %v2670_v7, %v2668_v5  ;;  %v2674_v63 = vpop.f32.mrb[14].mxu1 }
 0x9ec   :  { %v2676_v10 = vpop.f32.mrb[15].mxu1 }
 0x9ed   :  { %829 = vadd.xlane.f32.xlu1 %v828_v56  ;;  %v831_v3 = vadd.f32 %v2662_v34, %v2659_v11  ;;  %v1550_v17 = vadd.f32 %v2676_v10, %v2674_v63 }
 0x9ef   :  { %832 = vadd.xlane.f32.xlu0 %v831_v3 }
 0x9f1   :  { %840 = vadd.xlane.f32.xlu1 %v2099_v29 }
 0x9f3   :  { %837 = vadd.xlane.f32.xlu0 %v2091_v13 }
 0x9f5   :  { %1551 = vadd.xlane.f32.xlu1 %v1550_v17 }
 0x9f7   :  { %1548 = vadd.xlane.f32.xlu0 %v1547_v9 }
 0xa7a   :  { %v830_v18 = vpop.xlane.xlu1 %829 }
 0xa7b   :  { %v834_v14 = vmul.f32 0.00390625, %v830_v18 }
 0xa7c   :  { %v833_v29 = vpop.xlane.xlu0 %832 }
 0xa7d   :  { %v835_v13 = vmul.f32 0.00390625, %v833_v29 }
 0xa7e   :  { %v841_v6 = vpop.xlane.xlu1 %840 }
 0xa7f   :  { %v844_v55 = vmax.f32 %v834_v14, %v835_v13  ;;  %v843_v0 = vmul.f32 0.00390625, %v841_v6 }
 0xa80   :  { %v838_v50 = vpop.xlane.xlu0 %837 }
 0xa81   :  { %v845_v23 = vrot.slane %v844_v55, 4  ;;  %v842_v8 = vmul.f32 0.00390625, %v838_v50 }
 0xa82   :  { %v1552_v29 = vpop.xlane.xlu1 %1551 }
 0xa83   :  { %v853_v1 = vmax.f32 %v842_v8, %v843_v0  ;;  %v846_v33 = vmax.f32 %v844_v55, %v845_v23  ;;  %v1554_v23 = vmul.f32 0.00390625, %v1552_v29 }
 0xa85   :  { %v854_v52 = vrot.slane %v853_v1, 4  ;;  %v847_v48 = vrot.slane %v846_v33, 2 }
 0xa87   :  { %v855_v57 = vmax.f32 %v853_v1, %v854_v52  ;;  %v848_v51 = vmax.f32 %v846_v33, %v847_v48 }
 0xa89   :  { %v849_v31 = vrot.slane %v848_v51, 1  ;;  %v856_v19 = vrot.slane %v855_v57, 2 }
 0xa8b   :  { %v850_v35 = vmax.f32 %v848_v51, %v849_v31  ;;  %v857_v24 = vmax.f32 %v855_v57, %v856_v19 }
 0xa8d   :  { %1737 = vpush %v850_v35  ;;  %v858_v49 = vrot.slane %v857_v24, 1 }
 0xa8f   :  { %v859_v4 = vmax.f32 %v857_v24, %v858_v49 }
 0xa91   :  { %1739 = vpush %v859_v4 }
 0xab6   :  { %v1475_v38 = vpop.f32.mrb[12].mxu0 }
 0xab7   :  { %v2680_v62 = vadd.f32 %v1475_v38, %v704_v41  ;;  %v1477_v32 = vpop.f32.mrb[13].mxu0 }
 0xab8   :  { %v2682_v53 = vadd.f32 %v1477_v32, %v704_v41  ;;  %v1479_v16 = vpop.f32.mrb[14].mxu0 }
 0xab9   :  { %v2684_v37 = vadd.f32 %v1479_v16, %v708_v59  ;;  %v1481_v43 = vpop.f32.mrb[15].mxu0 }
 0xaba   :  { %v1539_v58 = vadd.f32 %v2682_v53, %v2680_v62  ;;  %v2688_v20 = vadd.f32 %v1481_v43, %v708_v59 }
 0xabc   :  { %v1542_v54 = vadd.f32 %v2688_v20, %v2684_v37  ;;  %1540 = vadd.xlane.f32.xlu0 %v1539_v58 }
 0xabe   :  { %1543 = vadd.xlane.f32.xlu1 %v1542_v54  ;;  %s1738_s2 = spop %1737 }
 0xabf   :  { %v852_v25 = vstv %s1738_s2 }
 0xac2   :  { %s1740_s22 = spop %1739 }
 0xac3   :  { %v861_v21 = vstv %s1740_s22 }
 0xac4   :  { %v862_v44 = vmax.f32 %v852_v25, %v861_v21 }
 0xac6   :  { %v863_v15 = vsub.f32 %v834_v14, %v862_v44  ;;  %v864_v45 = vsub.f32 %v835_v13, %v862_v44  ;;  %v869_v61 = vsub.f32 %v842_v8, %v862_v44  ;;  %v870_v36 = vsub.f32 %v843_v0, %v862_v44  ;;  %v1549_v14 = vpop.xlane.xlu0 %1548 }
 0xac7   :  { %v1553_v50 = vmul.f32 0.00390625, %v1549_v14 }
 0xac8   :  { %v865_v60 = vmul.f32 1.442695, %v863_v15  ;;  %v867_v22 = vmul.f32 1.442695, %v864_v45  ;;  %v871_v39 = vmul.f32 1.442695, %v869_v61 }
 0xac9   :  { %v873_v2 = vmul.f32 1.442695, %v870_v36  ;;  %v1564_v1 = vmax.f32 %v1553_v50, %v1554_v23 }
 0xaca   :  { %1802 = vpow2.f32 %v865_v60 }
 0xacb   :  { %1804 = vpow2.f32 %v867_v22  ;;  %v1565_v52 = vrot.slane %v1564_v1, 4 }
 0xacc   :  { %1806 = vpow2.f32 %v871_v39 }
 0xacd   :  { %1808 = vpow2.f32 %v873_v2  ;;  %v1566_v57 = vmax.f32 %v1564_v1, %v1565_v52 }
 0xacf   :  { %v1567_v4 = vrot.slane %v1566_v57, 2 }
 0xad1   :  { %v1568_v54 = vmax.f32 %v1566_v57, %v1567_v4 }
 0xad3   :  { %v1569_v61 = vrot.slane %v1568_v54, 1 }
 0xad4   :  { %v2692_v42 = vpop.eup %1802 }
 0xad5   :  { %v2694_v40 = vpop.eup %1804  ;;  %v875_v46 = vsel %vm77_vm1, %v2692_v42, 0.0  ;;  %v1570_v22 = vmax.f32 %v1568_v54, %v1569_v61 }
 0xad6   :  { %v2698_v41 = vpop.eup %1806  ;;  %v876_v59 = vsel %vm77_vm1, %v2694_v40, 0.0 }
 0xad7   :  { %v2702_v56 = vpop.eup %1808  ;;  %v888_v3 = vsel %vm77_vm1, %v2698_v41, 0.0  ;;  %v877_v9 = vadd.f32 %v876_v59, %v875_v46 }
 0xad8   :  { %v889_v17 = vsel %vm77_vm1, %v2702_v56, 0.0 }
 0xad9   :  { %v890_v18 = vadd.f32 %v889_v17, %v888_v3  ;;  %878 = vadd.xlane.f32.xlu0 %v877_v9 }
 0xadb   :  { %891 = vadd.xlane.f32.xlu1 %v890_v18 }
 0xb49   :  { %v1541_v6 = vpop.xlane.xlu0 %1540 }
 0xb4a   :  { %v1545_v0 = vmul.f32 0.00390625, %v1541_v6 }
 0xb4b   :  { %v1544_v13 = vpop.xlane.xlu1 %1543 }
 0xb4c   :  { %v1546_v55 = vmul.f32 0.00390625, %v1544_v13 }
 0xb4e   :  { %v1555_v8 = vmax.f32 %v1545_v0, %v1546_v55 }
 0xb50   :  { %v1556_v33 = vrot.slane %v1555_v8, 4 }
 0xb52   :  { %v1557_v48 = vmax.f32 %v1555_v8, %v1556_v33 }
 0xb54   :  { %v1558_v35 = vrot.slane %v1557_v48, 2 }
 0xb56   :  { %v1559_v16 = vmax.f32 %v1557_v48, %v1558_v35 }
 0xb58   :  { %v1560_v44 = vrot.slane %v1559_v16, 1 }
 0xb5a   :  { %v1561_v60 = vmax.f32 %v1559_v16, %v1560_v44 }
 0xb66   :  { %v879_v51 = vpop.xlane.xlu0 %878 }
 0xb67   :  { %v880_v31 = vrot.slane %v879_v51, 4 }
 0xb68   :  { %v892_v19 = vpop.xlane.xlu1 %891 }
 0xb69   :  { %v881_v24 = vadd.f32 %v880_v31, %v879_v51  ;;  %v893_v49 = vrot.slane %v892_v19, 4 }
 0xb6b   :  { %v882_v38 = vrot.slane %v881_v24, 2  ;;  %v894_v32 = vadd.f32 %v893_v49, %v892_v19 }
 0xb6d   :  { %v895_v43 = vrot.slane %v894_v32, 2  ;;  %v883_v58 = vadd.f32 %v882_v38, %v881_v24 }
 0xb6f   :  { %v884_v25 = vrot.slane %v883_v58, 1  ;;  %v896_v21 = vadd.f32 %v895_v43, %v894_v32 }
 0xb71   :  { %v885_v15 = vadd.f32 %v884_v25, %v883_v58  ;;  %v897_v45 = vrot.slane %v896_v21, 1 }
 0xb73   :  { %1741 = vpush %v885_v15  ;;  %v898_v36 = vadd.f32 %v897_v45, %v896_v21 }
 0xb75   :  { %1743 = vpush %v898_v36 }
 0xb76   :  { %1745 = vpush %v1561_v60 }
 0xb77   :  { %1747 = vpush %v1570_v22 }
 0xba4   :  { %s1742_s23 = spop %1741 }
 0xba5   :  { %v887_v39 = vstv %s1742_s23 }
 0xba6   :  { %s1744_s6 = spop %1743 }
 0xba7   :  { %v900_v2 = vstv %s1744_s6  ;;  %s1746_s24 = spop %1745 }
 0xba8   :  { %v901_v46 = vadd.f32 %v900_v2, %v887_v39  ;;  %v1563_v59 = vstv %s1746_s24  ;;  %s1748_s25 = spop %1747 }
 0xba9   :  { %v1572_v3 = vstv %s1748_s25 }
 0xbaa   :  { %1810 = vrcp.f32 %v901_v46  ;;  %v1573_v9 = vmax.f32 %v1563_v59, %v1572_v3 }
 0xbac   :  { %v1574_v17 = vsub.f32 %v1545_v0, %v1573_v9  ;;  %v1575_v18 = vsub.f32 %v1546_v55, %v1573_v9  ;;  %v1580_v29 = vsub.f32 %v1553_v50, %v1573_v9  ;;  %v1581_v14 = vsub.f32 %v1554_v23, %v1573_v9 }
 0xbae   :  { %v1576_v13 = vmul.f32 1.442695, %v1574_v17  ;;  %v1578_v6 = vmul.f32 1.442695, %v1575_v18  ;;  %v1582_v8 = vmul.f32 1.442695, %v1580_v29 }
 0xbaf   :  { %v1584_v1 = vmul.f32 1.442695, %v1581_v14 }
 0xbb0   :  { %1812 = vpow2.f32 %v1576_v13 }
 0xbb1   :  { %1814 = vpow2.f32 %v1578_v6 }
 0xbb2   :  { %1816 = vpow2.f32 %v1582_v8 }
 0xbb3   :  { %1818 = vpow2.f32 %v1584_v1 }
 0xbb4   :  { %v1811_v33 = vpop.eup %1810 }
 0xbb5   :  { %v903_v52 = vmul.f32 %v1811_v33, %v2692_v42  ;;  %v904_v48 = vmul.f32 %v1811_v33, %v2694_v40  ;;  %v909_v57 = vmul.f32 %v1811_v33, %v2698_v41  ;;  %v910_v0 = vmul.f32 %v1811_v33, %v2702_v56 }
 0xbb7   :  { %v905_v55 = vmul.f32 %v903_v52, %v2651_v30  ;;  %v906_v50 = vmul.f32 %v903_v52, %v2654_v47  ;;  %v907_v23 = vmul.f32 %v904_v48, %v2659_v11  ;;  %v908_v51 = vmul.f32 %v904_v48, %v2662_v34 }
 0xbb8   :  { %v911_v31 = vmul.f32 %v909_v57, %v2085_v12  ;;  %v912_v19 = vmul.f32 %v909_v57, %v2087_v26  ;;  %v913_v42 = vmul.f32 %v910_v0, %v2093_v27  ;;  %v914_v40 = vmul.f32 %v910_v0, %v2095_v28 }
 0xbba   :  { %v1813_v35 = vpop.eup %1812  ;;  %v915_v41 = vadd.f32 %v911_v31, %v905_v55  ;;  %v916_v24 = vadd.f32 %v912_v19, %v906_v50  ;;  %v917_v56 = vadd.f32 %v913_v42, %v907_v23  ;;  %v918_v49 = vadd.f32 %v914_v40, %v908_v51 }
 0xbbb   :  { %v1815_v30 = vpop.eup %1814  ;;  %v1586_v47 = vsel %vm77_vm1, %v1813_v35, 0.0 }
 0xbbc   :  { %v1817_v4 = vpop.eup %1816  ;;  %v1587_v11 = vsel %vm77_vm1, %v1815_v30, 0.0  ;;  %919 = vst [vmem:[#allocation6] sm:$0xff] %v915_v41  ;;  %920 = vst [vmem:[#allocation6 + $0x8] sm:$0xff] %v916_v24 }
 0xbbd   :  { %921 = vst [vmem:[#allocation6 + $0x10] sm:$0xff] %v917_v56  ;;  %922 = vst [vmem:[#allocation6 + $0x18] sm:$0xff] %v918_v49  ;;  %v1819_v12 = vpop.eup %1818  ;;  %v1599_v26 = vsel %vm77_vm1, %v1817_v4, 0.0  ;;  %v1588_v27 = vadd.f32 %v1587_v11, %v1586_v47 }
 0xbbe   :  { %v1600_v28 = vsel %vm77_vm1, %v1819_v12, 0.0 }
 0xbbf   :  { %v1601_v34 = vadd.f32 %v1600_v28, %v1599_v26  ;;  %1589 = vadd.xlane.f32.xlu0 %v1588_v27 }
 0xbc1   :  { %1602 = vadd.xlane.f32.xlu1 %v1601_v34 }
 0xc4c   :  { %v1590_v38 = vpop.xlane.xlu0 %1589 }
 0xc4d   :  { %v1591_v32 = vrot.slane %v1590_v38, 4 }
 0xc4e   :  { %v1603_v16 = vpop.xlane.xlu1 %1602 }
 0xc4f   :  { %v1604_v43 = vrot.slane %v1603_v16, 4  ;;  %v1592_v58 = vadd.f32 %v1591_v32, %v1590_v38 }
 0xc51   :  { %v1605_v54 = vadd.f32 %v1604_v43, %v1603_v16  ;;  %v1593_v25 = vrot.slane %v1592_v58, 2 }
 0xc53   :  { %v1606_v21 = vrot.slane %v1605_v54, 2  ;;  %v1594_v44 = vadd.f32 %v1593_v25, %v1592_v58 }
 0xc55   :  { %v1607_v15 = vadd.f32 %v1606_v21, %v1605_v54  ;;  %v1595_v45 = vrot.slane %v1594_v44, 1 }
 0xc57   :  { %v1596_v61 = vadd.f32 %v1595_v45, %v1594_v44  ;;  %v1608_v36 = vrot.slane %v1607_v15, 1 }
 0xc59   :  { %1749 = vpush %v1596_v61  ;;  %v1609_v60 = vadd.f32 %v1608_v36, %v1607_v15 }
 0xc5b   :  { %1751 = vpush %v1609_v60 }
 0xc8a   :  { %s1750_s26 = spop %1749 }
 0xc8b   :  { %v1598_v22 = vstv %s1750_s26 }
 0xc8c   :  { %s1752_s27 = spop %1751 }
 0xc8d   :  { %v1611_v39 = vstv %s1752_s27 }
 0xc8e   :  { %v1612_v2 = vadd.f32 %v1611_v39, %v1598_v22 }
 0xc90   :  { %1820 = vrcp.f32 %v1612_v2 }
 0xc9a   :  { %v1821_v46 = vpop.eup %1820 }
 0xc9b   :  { %v1614_v59 = vmul.f32 %v1821_v46, %v1813_v35  ;;  %v1615_v3 = vmul.f32 %v1821_v46, %v1815_v30  ;;  %v1620_v9 = vmul.f32 %v1821_v46, %v1817_v4  ;;  %v1621_v17 = vmul.f32 %v1821_v46, %v1819_v12 }
 0xc9d   :  { %v1616_v18 = vmul.f32 %v1614_v59, %v2680_v62  ;;  %v1617_v29 = vmul.f32 %v1614_v59, %v2682_v53  ;;  %v1618_v14 = vmul.f32 %v1615_v3, %v2684_v37  ;;  %v1619_v13 = vmul.f32 %v1615_v3, %v2688_v20 }
 0xc9e   :  { %v1622_v6 = vmul.f32 %v1620_v9, %v2668_v5  ;;  %v1623_v8 = vmul.f32 %v1620_v9, %v2670_v7  ;;  %v1624_v1 = vmul.f32 %v1621_v17, %v2674_v63  ;;  %v1625_v33 = vmul.f32 %v1621_v17, %v2676_v10 }
 0xca0   :  { %v1626_v52 = vadd.f32 %v1622_v6, %v1616_v18  ;;  %v1627_v48 = vadd.f32 %v1623_v8, %v1617_v29  ;;  %v1628_v57 = vadd.f32 %v1624_v1, %v1618_v14  ;;  %v1629_v62 = vadd.f32 %v1625_v33, %v1619_v13 }
 0xca2   :  { %1631 = vst [vmem:[#allocation6 + $0x20] sm:$0xff] %v1626_v52  ;;  %1632 = vst [vmem:[#allocation6 + $0x28] sm:$0xff] %v1627_v48 }
 0xca3   :  { %1633 = vst [vmem:[#allocation6 + $0x30] sm:$0xff] %v1628_v57  ;;  %1634 = vst [vmem:[#allocation6 + $0x38] sm:$0xff] %v1629_v62 }
 0xca4   :  { %1857 = shalt.err (!%p1854_p12)
}
 0xca5   :  { %s1858_s10 = scalar_lea.hbm %s2754_s7, 1024 }
 0xca6   :  { %p1859_p13 = scmp.ne.s32.totalorder %s2754_s7, %s1858_s10  ;;  %p1862_p0 = scmp.lt.u32.totalorder %s1858_s10, %s2754_s7 }
 0xca8   :  { %p1864_p1 = pnand %p1862_p0, %p1859_p13 }
 0xcaa   :  { %1867 = shalt.err (!%p1864_p1)
}
 0xcab   :  { %1646 = dma.vmem_to_hbm [thread:$0]  %s1641_s29, 1024, %s2754_s7, [#allocation5], %s1873_s11, %s1873_s11, %s1874_s12  }
 0xcac   :  { %1870 = dma.done.wait [#allocation5], 1024  }
 0xcad   :  { %1871 = vsyncadd [#allocation5], 4294966272 }
 0xcae   :  { %1650 = vsyncpa [#allocation4], 1 }
 0xcaf   :  { %1651 = vsyncpa [#allocation5], 1 }

</bundles_post_ra>
